<compile_context>
chip_gen: v6e
topology: v6e:2x2x1
jax: 0.10.0
libtpu: 0.0.40
codegen_flags: <defaults>
</compile_context>

<pallas_src>
import functools

import jax
import jax.numpy as jnp
from jax.experimental import pallas as pl
from jax.experimental.pallas import tpu as pltpu


# ----------------------------------------------------------------------------
# Kernels
# ----------------------------------------------------------------------------
def soa_proj_kernel(x_ref, w_ref, b_ref, f_ref, g_ref, h_ref):
    """Fused f/g/h 1x1-conv projection for one (batch, HW-tile) block.

    x_ref:  (1, C, TP)    f32   input tile
    w_ref:  (3*mid, C)    bf16  fused conv weight (BN + softmax scale folded)
    b_ref:  (3*mid, 1)    f32   fused conv bias
    f/g/h_ref: (1, mid, TP) bf16 outputs (ReLU applied to f and g)
    """
    mid = f_ref.shape[1]
    xb = x_ref[0].astype(jnp.bfloat16)                                  # (C, TP)
    fgh = jnp.dot(w_ref[...], xb,
                  preferred_element_type=jnp.float32) + b_ref[...]     # (3m, TP)
    f_ref[0] = jnp.maximum(fgh[0:mid], 0.0).astype(jnp.bfloat16)
    g_ref[0] = jnp.maximum(fgh[mid:2 * mid], 0.0).astype(jnp.bfloat16)
    h_ref[0] = fgh[2 * mid:3 * mid].astype(jnp.bfloat16)


def soa_attn_kernel(x_ref, f_ref, g_ref, h_ref, wv_ref, bv_ref, o_ref, *,
                    use_bf16_exp):
    """Attention + v-projection + residual for one (batch, q-tile) block.

    x_ref:  (1, C, TQ)   f32  residual tile
    f_ref:  (1, mid, TQ) bf16 query-tile of F (softmax scale pre-folded)
    g_ref:  (1, mid, HW) bf16 full G for this batch
    h_ref:  (1, mid, HW) bf16 full H for this batch
    wv_ref: (C, mid)     bf16 ; bv_ref: (C, 1) f32
    o_ref:  (1, C, TQ)   f32
    """
    f_q = f_ref[0]                                                      # (m, TQ)
    g = g_ref[0]                                                        # (m, HW)
    h = h_ref[0]                                                        # (m, HW)

    # Scores S[i, j] = sum_m F[m, i] * G[m, j]  (scale already folded into F).
    s = jax.lax.dot_general(f_q, g, (((0,), (0,)), ((), ())),
                            preferred_element_type=jnp.float32)         # (TQ, HW)
    s = s - jnp.max(s, axis=-1, keepdims=True)

    if use_bf16_exp:
        p = jnp.exp(s.astype(jnp.bfloat16))                             # bf16 EUP
        l = jnp.sum(p, axis=-1, keepdims=True, dtype=jnp.float32)       # (TQ, 1)
    else:
        p32 = jnp.exp(s)                                                # f32 EUP (v5e)
        l = jnp.sum(p32, axis=-1, keepdims=True)
        p = p32.astype(jnp.bfloat16)

    # Unnormalized z[i, m] = sum_j p[i, j] * H[m, j]; normalization deferred
    # to the small (TQ, mid) result (mid*TQ mults instead of TQ*HW).
    z = jax.lax.dot_general(p, h, (((1,), (1,)), ((), ())),
                            preferred_element_type=jnp.float32)         # (TQ, m)
    z = z * pl.reciprocal(l, approx=True)

    # out[c, i] = sum_m Wv[c, m] * z[i, m]  (+ bias + residual).
    out = jax.lax.dot_general(wv_ref[...], z.astype(jnp.bfloat16),
                              (((1,), (1,)), ((), ())),
                              preferred_element_type=jnp.float32)       # (C, TQ)
    o_ref[0] = out + bv_ref[...] + x_ref[0]


# ----------------------------------------------------------------------------
# Wrapper
# ----------------------------------------------------------------------------
def _fold_bn(w, b, bn, eps=1e-5):
    """Fold eval-mode BatchNorm2d into a 1x1-conv weight (mid, C) / bias (mid,)."""
    s = bn["gamma"] / jnp.sqrt(bn["var"] + eps)
    return w * s[:, None], (b - bn["mean"]) * s + bn["beta"]


def _tpu_generation():
    try:
        kind = jax.devices()[0].device_kind.lower()
    except Exception:
        return 6
    for g in (7, 6, 5):
        if f"v{g}" in kind:
            return g
    return 6


def _pick_tq(hw, gen):
    """Query-tile size: lane-aligned, MXU-native per generation, VMEM-capped."""
    if hw % 128 != 0:
        return hw     # TODO(synk): pad HW to a 128 multiple + mask padded keys
    pref = 128 if gen <= 5 else 256
    tq = pref if hw % pref == 0 else 128
    while tq > 128 and tq * hw * 4 > (8 << 20):   # keep f32 score tile <= 8 MiB
        tq //= 2
    return tq


def _pick_tp(hw):
    """HW-tile size for the projection kernel."""
    if hw % 128 != 0:
        return hw
    for t in (512, 256, 128):
        if hw % t == 0:
            return t
    return 128


def soa_forward(x_nchw, params, vis_mode=False):
    """x_nchw: (B, C, H, W) float32. Returns (B, C, H, W) float32."""
    B, C, H, W = x_nchw.shape
    HW = H * W
    mid = params["wf"].shape[0]
    scale = float(mid) ** (-0.75 if vis_mode else -0.5)

    # Fold eval-mode BN into the f/g convs; fold the softmax scale into the f
    # branch (valid: ReLU is positively homogeneous and scale > 0).
    wf, bf = _fold_bn(params["wf"], params["bf"], params["bn_f"])
    wg, bg = _fold_bn(params["wg"], params["bg"], params["bn_g"])
    wf, bf = wf * scale, bf * scale

    w_fgh = jnp.concatenate([wf, wg, params["wh"]], axis=0).astype(jnp.bfloat16)
    b_fgh = jnp.concatenate([bf, bg, params["bh"]], axis=0)[:, None]
    b_fgh = b_fgh.astype(jnp.float32)                                    # (3m, 1)
    wv = params["wv"].astype(jnp.bfloat16)                               # (C, m)
    bv = params["bv"][:, None].astype(jnp.float32)                       # (C, 1)

    x = x_nchw.reshape(B, C, HW).astype(jnp.float32)                     # free reshape

    gen = _tpu_generation()
    use_bf16_exp = gen >= 6          # v6e/v7x have a bf16 EUP; keep f32 on v5e
    vmem_limit = (64 if gen <= 6 else 48) * 1024 * 1024

    # ---- Kernel 1: fused f/g/h projection (hoisted out of the attention loop).
    tp = _pick_tp(HW)
    f_p, g_p, h_p = pl.pallas_call(
        soa_proj_kernel,
        out_shape=tuple(jax.ShapeDtypeStruct((B, mid, HW), jnp.bfloat16)
                        for _ in range(3)),
        grid_spec=pltpu.PrefetchScalarGridSpec(
            num_scalar_prefetch=0,
            grid=(B, HW // tp),
            in_specs=[
                pl.BlockSpec((1, C, tp), lambda b, t: (b, 0, t)),     # x tile
                pl.BlockSpec((3 * mid, C), lambda b, t: (0, 0)),      # fused weight
                pl.BlockSpec((3 * mid, 1), lambda b, t: (0, 0)),      # fused bias
            ],
            out_specs=[pl.BlockSpec((1, mid, tp), lambda b, t: (b, 0, t))
                       for _ in range(3)],
        ),
        compiler_params=pltpu.CompilerParams(
            dimension_semantics=("parallel", "parallel"),
            vmem_limit_bytes=vmem_limit),
        cost_estimate=pl.CostEstimate(
            flops=2 * B * 3 * mid * C * HW, transcendentals=0,
            bytes_accessed=B * HW * (4 * C + 6 * mid)),
    )(x, w_fgh, b_fgh)

    # ---- Kernel 2: attention + v projection + residual.
    tq = _pick_tq(HW, gen)
    nq = HW // tq
    out = pl.pallas_call(
        functools.partial(soa_attn_kernel, use_bf16_exp=use_bf16_exp),
        out_shape=jax.ShapeDtypeStruct((B, C, HW), jnp.float32),
        grid_spec=pltpu.PrefetchScalarGridSpec(
            num_scalar_prefetch=0,
            grid=(B, nq),
            in_specs=[
                pl.BlockSpec((1, C, tq), lambda b, q: (b, 0, q)),     # residual (f32)
                pl.BlockSpec((1, mid, tq), lambda b, q: (b, 0, q)),   # F q-tile
                pl.BlockSpec((1, mid, HW), lambda b, q: (b, 0, 0)),   # G (per batch)
                pl.BlockSpec((1, mid, HW), lambda b, q: (b, 0, 0)),   # H (per batch)
                pl.BlockSpec((C, mid), lambda b, q: (0, 0)),          # v weight
                pl.BlockSpec((C, 1), lambda b, q: (0, 0)),            # v bias
            ],
            out_specs=pl.BlockSpec((1, C, tq), lambda b, q: (b, 0, q)),
        ),
        compiler_params=pltpu.CompilerParams(
            dimension_semantics=("parallel", "parallel"),
            vmem_limit_bytes=vmem_limit),
        cost_estimate=pl.CostEstimate(
            flops=2 * B * (2 * HW * HW * mid + HW * mid * C),
            transcendentals=B * HW * HW,
            bytes_accessed=B * HW * (8 * C + 6 * mid)),
    )(x, f_p, g_p, h_p, wv, bv)

    return out.reshape(B, C, H, W)


# ----------------------------------------------------------------------------
# Parameter init (matches SOA.__init__ semantics) and pure-JAX reference
# ----------------------------------------------------------------------------
def init_params(key, in_ch, k):
    """f/g/h convs: kaiming_normal weight, zero bias; BN defaults; v conv: zeros.

    Conv weights stored as (C_out, C_in), i.e. PyTorch-native for a 1x1 conv.
    """
    mid = in_ch // k
    kf, kg, kh = jax.random.split(key, 3)
    std = (2.0 / in_ch) ** 0.5
    bn_default = dict(gamma=jnp.ones((mid,), jnp.float32),
                      beta=jnp.zeros((mid,), jnp.float32),
                      mean=jnp.zeros((mid,), jnp.float32),
                      var=jnp.ones((mid,), jnp.float32))
    return dict(
        wf=jax.random.normal(kf, (mid, in_ch), jnp.float32) * std,
        bf=jnp.zeros((mid,), jnp.float32),
        wg=jax.random.normal(kg, (mid, in_ch), jnp.float32) * std,
        bg=jnp.zeros((mid,), jnp.float32),
        wh=jax.random.normal(kh, (mid, in_ch), jnp.float32) * std,
        bh=jnp.zeros((mid,), jnp.float32),
        wv=jnp.zeros((in_ch, mid), jnp.float32),
        bv=jnp.zeros((in_ch,), jnp.float32),
        bn_f=dict(bn_default),
        bn_g=dict(bn_default),
    )


def soa_reference(x_nchw, params, vis_mode=False):
    """Pure-JAX f32 reference of the PyTorch forward (eval-mode BN)."""
    B, C, H, W = x_nchw.shape
    HW = H * W
    mid = params["wf"].shape[0]
    scale = float(mid) ** (-0.75 if vis_mode else -0.5)
    x = x_nchw.reshape(B, C, HW).astype(jnp.float32)
    wf, bf = _fold_bn(params["wf"], params["bf"], params["bn_f"])
    wg, bg = _fold_bn(params["wg"], params["bg"], params["bn_g"])
    f = jax.nn.relu(jnp.einsum("mc,bcn->bmn", wf, x) + bf[None, :, None])
    g = jax.nn.relu(jnp.einsum("mc,bcn->bmn", wg, x) + bg[None, :, None])
    h = jnp.einsum("mc,bcn->bmn", params["wh"], x) + params["bh"][None, :, None]
    s = scale * jnp.einsum("bmq,bmk->bqk", f, g)
    attn = jax.nn.softmax(s, axis=-1)
    z = jnp.einsum("bqk,bmk->bmq", attn, h)
    out = jnp.einsum("cm,bmq->bcq", params["wv"], z) \
        + params["bv"][None, :, None] + x
    return out.reshape(B, C, H, W)


if __name__ == "__main__":
    B, C, H, W = 2, 32, 16, 16
    k = 4                                                    # mid_ch = 8

    key = jax.random.PRNGKey(0)
    kx, kp, kv = jax.random.split(key, 3)
    x = jax.random.normal(kx, (B, C, H, W), jnp.float32)
    params = init_params(kp, C, k)

    fwd = jax.jit(soa_forward, static_argnames=("vis_mode",))

    # 1) Faithful init (v conv zero-initialized -> output == x, f32 residual).
    out = fwd(x, params)
    jax.block_until_ready(out)
    ref = soa_reference(x, params)
    assert jnp.allclose(out, ref, atol=1e-4, rtol=1e-4)

    # 2) Nonzero v conv exercises the full attention path. bf16 MXU operands
    #    (f32 accumulation), bf16 exp on v6e/v7x, deferred normalization with
    #    approx EUP reciprocal -> relaxed tolerance vs the f32 reference.
    params2 = dict(params)
    params2["wv"] = jax.random.normal(kv, params["wv"].shape, jnp.float32) * 0.1
    out2 = fwd(x, params2)
    jax.block_until_ready(out2)
    ref2 = soa_reference(x, params2)
    assert jnp.allclose(out2, ref2, atol=3e-2, rtol=3e-2), \
        float(jnp.max(jnp.abs(out2 - ref2)))

    # 3) vis_mode=True exercises the alternate softmax scale (folded into wf).
    out3 = fwd(x, params2, vis_mode=True)
    jax.block_until_ready(out3)
    ref3 = soa_reference(x, params2, vis_mode=True)
    assert jnp.allclose(out3, ref3, atol=3e-2, rtol=3e-2), \
        float(jnp.max(jnp.abs(out3 - ref3)))

    print("KERNEL_OK")
</pallas_src>

<mosaic_0001>
module attributes {stable_mosaic.version = 11 : i64} {
  func.func @soa_proj_kernel(%arg0: i32, %arg1: i32, %arg2: memref<1x32x256xf32, #tpu.memory_space<vmem>>, %arg3: memref<24x32xbf16, #tpu.memory_space<vmem>>, %arg4: memref<24x1xf32, #tpu.memory_space<vmem>>, %arg5: memref<1x8x256xbf16, #tpu.memory_space<vmem>>, %arg6: memref<1x8x256xbf16, #tpu.memory_space<vmem>>, %arg7: memref<1x8x256xbf16, #tpu.memory_space<vmem>>) attributes {dimension_semantics = [#tpu.dimension_semantics<parallel>, #tpu.dimension_semantics<parallel>], iteration_bounds = array<i64: 2, 1>, scalar_prefetch = 0 : i64, scratch_operands = 0 : i64, tpu.core_type = #tpu.core_type<tc>, window_params = [{transform_indices = @transform_0, window_bounds = array<i64: 1, 32, 256>}, {pipeline_mode = #tpu.pipeline_mode<synchronous>, transform_indices = @transform_1, window_bounds = array<i64: 24, 32>}, {pipeline_mode = #tpu.pipeline_mode<synchronous>, transform_indices = @transform_2, window_bounds = array<i64: 24, 1>}, {transform_indices = @transform_3, window_bounds = array<i64: 1, 8, 256>}, {transform_indices = @transform_4, window_bounds = array<i64: 1, 8, 256>}, {transform_indices = @transform_5, window_bounds = array<i64: 1, 8, 256>}]} {
    %c0 = arith.constant 0 : index
    %c0_0 = arith.constant 0 : index
    %c0_1 = arith.constant 0 : index
    %0 = vector.load %arg2[%c0, %c0_0, %c0_1] : memref<1x32x256xf32, #tpu.memory_space<vmem>>, vector<1x32x256xf32>
    %1 = vector.shape_cast %0 : vector<1x32x256xf32> to vector<32x256xf32>
    %2 = arith.truncf %1 : vector<32x256xf32> to vector<32x256xbf16>
    %c0_2 = arith.constant 0 : index
    %c0_3 = arith.constant 0 : index
    %3 = vector.load %arg3[%c0_2, %c0_3] : memref<24x32xbf16, #tpu.memory_space<vmem>>, vector<24x32xbf16>
    %cst = arith.constant dense<0.000000e+00> : vector<24x256xf32>
    %4 = tpu.matmul %3, %2, %cst {dimension_numbers = #tpu.dot_dimension_numbers<[1], [0], [0], [1], [0, 0, 1, 1], [], []>} : vector<24x32xbf16>, vector<32x256xbf16>, vector<24x256xf32> -> vector<24x256xf32>
    %c0_4 = arith.constant 0 : index
    %c0_5 = arith.constant 0 : index
    %5 = vector.load %arg4[%c0_4, %c0_5] : memref<24x1xf32, #tpu.memory_space<vmem>>, vector<24x1xf32>
    %6 = vector.broadcast %5 : vector<24x1xf32> to vector<24x256xf32>
    %7 = arith.addf %4, %6 : vector<24x256xf32>
    %8 = vector.extract_strided_slice %7 {offsets = [0, 0], sizes = [8, 256], strides = [1, 1]} : vector<24x256xf32> to vector<8x256xf32>
    %cst_6 = arith.constant 0.000000e+00 : f32
    %9 = vector.broadcast %cst_6 : f32 to vector<8x256xf32>
    %10 = arith.maximumf %8, %9 : vector<8x256xf32>
    %11 = arith.truncf %10 : vector<8x256xf32> to vector<8x256xbf16>
    %c0_7 = arith.constant 0 : index
    %c0_8 = arith.constant 0 : index
    %c0_9 = arith.constant 0 : index
    %12 = vector.load %arg5[%c0_7, %c0_8, %c0_9] : memref<1x8x256xbf16, #tpu.memory_space<vmem>>, vector<1x8x256xbf16>
    %13 = vector.shape_cast %12 : vector<1x8x256xbf16> to vector<8x256xbf16>
    %14 = vector.shape_cast %11 : vector<8x256xbf16> to vector<1x8x256xbf16>
    tpu.vector_store %arg5[%c0_7, %c0_8, %c0_9], %14 {strides = array<i32>} : memref<1x8x256xbf16, #tpu.memory_space<vmem>>, vector<1x8x256xbf16>,
    %15 = vector.extract_strided_slice %7 {offsets = [8, 0], sizes = [8, 256], strides = [1, 1]} : vector<24x256xf32> to vector<8x256xf32>
    %cst_10 = arith.constant 0.000000e+00 : f32
    %16 = vector.broadcast %cst_10 : f32 to vector<8x256xf32>
    %17 = arith.maximumf %15, %16 : vector<8x256xf32>
    %18 = arith.truncf %17 : vector<8x256xf32> to vector<8x256xbf16>
    %c0_11 = arith.constant 0 : index
    %c0_12 = arith.constant 0 : index
    %c0_13 = arith.constant 0 : index
    %19 = vector.load %arg6[%c0_11, %c0_12, %c0_13] : memref<1x8x256xbf16, #tpu.memory_space<vmem>>, vector<1x8x256xbf16>
    %20 = vector.shape_cast %19 : vector<1x8x256xbf16> to vector<8x256xbf16>
    %21 = vector.shape_cast %18 : vector<8x256xbf16> to vector<1x8x256xbf16>
    tpu.vector_store %arg6[%c0_11, %c0_12, %c0_13], %21 {strides = array<i32>} : memref<1x8x256xbf16, #tpu.memory_space<vmem>>, vector<1x8x256xbf16>,
    %22 = vector.extract_strided_slice %7 {offsets = [16, 0], sizes = [8, 256], strides = [1, 1]} : vector<24x256xf32> to vector<8x256xf32>
    %23 = arith.truncf %22 : vector<8x256xf32> to vector<8x256xbf16>
    %c0_14 = arith.constant 0 : index
    %c0_15 = arith.constant 0 : index
    %c0_16 = arith.constant 0 : index
    %24 = vector.load %arg7[%c0_14, %c0_15, %c0_16] : memref<1x8x256xbf16, #tpu.memory_space<vmem>>, vector<1x8x256xbf16>
    %25 = vector.shape_cast %24 : vector<1x8x256xbf16> to vector<8x256xbf16>
    %26 = vector.shape_cast %23 : vector<8x256xbf16> to vector<1x8x256xbf16>
    tpu.vector_store %arg7[%c0_14, %c0_15, %c0_16], %26 {strides = array<i32>} : memref<1x8x256xbf16, #tpu.memory_space<vmem>>, vector<1x8x256xbf16>,
    return
  }
  func.func @transform_0(%arg0: i32, %arg1: i32) -> (i32, i32, i32) {
    %c0_i32 = arith.constant 0 : i32
    %c0_i32_0 = arith.constant 0 : i32
    return %arg0, %c0_i32, %arg1 : i32, i32, i32
  }
  func.func @transform_1(%arg0: i32, %arg1: i32) -> (i32, i32) {
    %c0_i32 = arith.constant 0 : i32
    %c0_i32_0 = arith.constant 0 : i32
    %c0_i32_1 = arith.constant 0 : i32
    return %c0_i32, %c0_i32_0 : i32, i32
  }
  func.func @transform_2(%arg0: i32, %arg1: i32) -> (i32, i32) {
    %c0_i32 = arith.constant 0 : i32
    %c0_i32_0 = arith.constant 0 : i32
    %c0_i32_1 = arith.constant 0 : i32
    return %c0_i32, %c0_i32_0 : i32, i32
  }
  func.func @transform_3(%arg0: i32, %arg1: i32) -> (i32, i32, i32) {
    %c0_i32 = arith.constant 0 : i32
    %c0_i32_0 = arith.constant 0 : i32
    return %arg0, %c0_i32, %arg1 : i32, i32, i32
  }
  func.func @transform_4(%arg0: i32, %arg1: i32) -> (i32, i32, i32) {
    %c0_i32 = arith.constant 0 : i32
    %c0_i32_0 = arith.constant 0 : i32
    return %arg0, %c0_i32, %arg1 : i32, i32, i32
  }
  func.func @transform_5(%arg0: i32, %arg1: i32) -> (i32, i32, i32) {
    %c0_i32 = arith.constant 0 : i32
    %c0_i32_0 = arith.constant 0 : i32
    return %arg0, %c0_i32, %arg1 : i32, i32, i32
  }
}

module attributes {stable_mosaic.version = 11 : i64} {
  func.func @soa_attn_kernel(%arg0: i32, %arg1: i32, %arg2: memref<1x32x256xf32, #tpu.memory_space<vmem>>, %arg3: memref<1x8x256xbf16, #tpu.memory_space<vmem>>, %arg4: memref<1x8x256xbf16, #tpu.memory_space<vmem>>, %arg5: memref<1x8x256xbf16, #tpu.memory_space<vmem>>, %arg6: memref<32x8xbf16, #tpu.memory_space<vmem>>, %arg7: memref<32x1xf32, #tpu.memory_space<vmem>>, %arg8: memref<1x32x256xf32, #tpu.memory_space<vmem>>) attributes {dimension_semantics = [#tpu.dimension_semantics<parallel>, #tpu.dimension_semantics<parallel>], iteration_bounds = array<i64: 2, 1>, scalar_prefetch = 0 : i64, scratch_operands = 0 : i64, tpu.core_type = #tpu.core_type<tc>, window_params = [{transform_indices = @transform_0, window_bounds = array<i64: 1, 32, 256>}, {transform_indices = @transform_1, window_bounds = array<i64: 1, 8, 256>}, {transform_indices = @transform_2, window_bounds = array<i64: 1, 8, 256>}, {transform_indices = @transform_3, window_bounds = array<i64: 1, 8, 256>}, {pipeline_mode = #tpu.pipeline_mode<synchronous>, transform_indices = @transform_4, window_bounds = array<i64: 32, 8>}, {pipeline_mode = #tpu.pipeline_mode<synchronous>, transform_indices = @transform_5, window_bounds = array<i64: 32, 1>}, {transform_indices = @transform_6, window_bounds = array<i64: 1, 32, 256>}]} {
    %c0 = arith.constant 0 : index
    %c0_0 = arith.constant 0 : index
    %c0_1 = arith.constant 0 : index
    %0 = vector.load %arg3[%c0, %c0_0, %c0_1] : memref<1x8x256xbf16, #tpu.memory_space<vmem>>, vector<1x8x256xbf16>
    %1 = vector.shape_cast %0 : vector<1x8x256xbf16> to vector<8x256xbf16>
    %c0_2 = arith.constant 0 : index
    %c0_3 = arith.constant 0 : index
    %c0_4 = arith.constant 0 : index
    %2 = vector.load %arg4[%c0_2, %c0_3, %c0_4] : memref<1x8x256xbf16, #tpu.memory_space<vmem>>, vector<1x8x256xbf16>
    %3 = vector.shape_cast %2 : vector<1x8x256xbf16> to vector<8x256xbf16>
    %c0_5 = arith.constant 0 : index
    %c0_6 = arith.constant 0 : index
    %c0_7 = arith.constant 0 : index
    %4 = vector.load %arg5[%c0_5, %c0_6, %c0_7] : memref<1x8x256xbf16, #tpu.memory_space<vmem>>, vector<1x8x256xbf16>
    %5 = vector.shape_cast %4 : vector<1x8x256xbf16> to vector<8x256xbf16>
    %cst = arith.constant dense<0.000000e+00> : vector<256x256xf32>
    %6 = tpu.matmul %1, %3, %cst {dimension_numbers = #tpu.dot_dimension_numbers<[0], [0], [1], [1], [0, 1, 1, 1], [], []>} : vector<8x256xbf16>, vector<8x256xbf16>, vector<256x256xf32> -> vector<256x256xf32>
    %cst_8 = arith.constant dense<0xFF800000> : vector<256xf32>
    %7 = vector.multi_reduction <maximumf>, %6, %cst_8 [1] : vector<256x256xf32> to vector<256xf32>
    %8 = vector.shape_cast %7 : vector<256xf32> to vector<256x1xf32>
    %9 = vector.broadcast %8 : vector<256x1xf32> to vector<256x256xf32>
    %10 = arith.subf %6, %9 : vector<256x256xf32>
    %11 = arith.truncf %10 : vector<256x256xf32> to vector<256x256xbf16>
    %12 = math.exp %11 : vector<256x256xbf16>
    %13 = arith.extf %12 : vector<256x256xbf16> to vector<256x256xf32>
    %cst_9 = arith.constant dense<0.000000e+00> : vector<256xf32>
    %14 = vector.multi_reduction <add>, %13, %cst_9 [1] : vector<256x256xf32> to vector<256xf32>
    %15 = vector.shape_cast %14 : vector<256xf32> to vector<256x1xf32>
    %cst_10 = arith.constant dense<0.000000e+00> : vector<256x8xf32>
    %16 = tpu.matmul %12, %5, %cst_10 {dimension_numbers = #tpu.dot_dimension_numbers<[1], [1], [0], [0], [0, 0, 1, 0], [], []>} : vector<256x256xbf16>, vector<8x256xbf16>, vector<256x8xf32> -> vector<256x8xf32>
    %17 = tpu.reciprocal %15 {approx = true} : vector<256x1xf32> -> vector<256x1xf32>
    %18 = vector.broadcast %17 : vector<256x1xf32> to vector<256x8xf32>
    %19 = arith.mulf %16, %18 : vector<256x8xf32>
    %c0_11 = arith.constant 0 : index
    %c0_12 = arith.constant 0 : index
    %20 = vector.load %arg6[%c0_11, %c0_12] : memref<32x8xbf16, #tpu.memory_space<vmem>>, vector<32x8xbf16>
    %21 = arith.truncf %19 : vector<256x8xf32> to vector<256x8xbf16>
    %cst_13 = arith.constant dense<0.000000e+00> : vector<32x256xf32>
    %22 = tpu.matmul %20, %21, %cst_13 {dimension_numbers = #tpu.dot_dimension_numbers<[1], [1], [0], [0], [0, 0, 1, 0], [], []>} : vector<32x8xbf16>, vector<256x8xbf16>, vector<32x256xf32> -> vector<32x256xf32>
    %c0_14 = arith.constant 0 : index
    %c0_15 = arith.constant 0 : index
    %23 = vector.load %arg7[%c0_14, %c0_15] : memref<32x1xf32, #tpu.memory_space<vmem>>, vector<32x1xf32>
    %24 = vector.broadcast %23 : vector<32x1xf32> to vector<32x256xf32>
    %25 = arith.addf %22, %24 : vector<32x256xf32>
    %c0_16 = arith.constant 0 : index
    %c0_17 = arith.constant 0 : index
    %c0_18 = arith.constant 0 : index
    %26 = vector.load %arg2[%c0_16, %c0_17, %c0_18] : memref<1x32x256xf32, #tpu.memory_space<vmem>>, vector<1x32x256xf32>
    %27 = vector.shape_cast %26 : vector<1x32x256xf32> to vector<32x256xf32>
    %28 = arith.addf %25, %27 : vector<32x256xf32>
    %c0_19 = arith.constant 0 : index
    %c0_20 = arith.constant 0 : index
    %c0_21 = arith.constant 0 : index
    %29 = vector.load %arg8[%c0_19, %c0_20, %c0_21] : memref<1x32x256xf32, #tpu.memory_space<vmem>>, vector<1x32x256xf32>
    %30 = vector.shape_cast %29 : vector<1x32x256xf32> to vector<32x256xf32>
    %31 = vector.shape_cast %28 : vector<32x256xf32> to vector<1x32x256xf32>
    tpu.vector_store %arg8[%c0_19, %c0_20, %c0_21], %31 {strides = array<i32>} : memref<1x32x256xf32, #tpu.memory_space<vmem>>, vector<1x32x256xf32>,
    return
  }
  func.func @transform_0(%arg0: i32, %arg1: i32) -> (i32, i32, i32) {
    %c0_i32 = arith.constant 0 : i32
    %c0_i32_0 = arith.constant 0 : i32
    return %arg0, %c0_i32, %arg1 : i32, i32, i32
  }
  func.func @transform_1(%arg0: i32, %arg1: i32) -> (i32, i32, i32) {
    %c0_i32 = arith.constant 0 : i32
    %c0_i32_0 = arith.constant 0 : i32
    return %arg0, %c0_i32, %arg1 : i32, i32, i32
  }
  func.func @transform_2(%arg0: i32, %arg1: i32) -> (i32, i32, i32) {
    %c0_i32 = arith.constant 0 : i32
    %c0_i32_0 = arith.constant 0 : i32
    %c0_i32_1 = arith.constant 0 : i32
    return %arg0, %c0_i32, %c0_i32_0 : i32, i32, i32
  }
  func.func @transform_3(%arg0: i32, %arg1: i32) -> (i32, i32, i32) {
    %c0_i32 = arith.constant 0 : i32
    %c0_i32_0 = arith.constant 0 : i32
    %c0_i32_1 = arith.constant 0 : i32
    return %arg0, %c0_i32, %c0_i32_0 : i32, i32, i32
  }
  func.func @transform_4(%arg0: i32, %arg1: i32) -> (i32, i32) {
    %c0_i32 = arith.constant 0 : i32
    %c0_i32_0 = arith.constant 0 : i32
    %c0_i32_1 = arith.constant 0 : i32
    return %c0_i32, %c0_i32_0 : i32, i32
  }
  func.func @transform_5(%arg0: i32, %arg1: i32) -> (i32, i32) {
    %c0_i32 = arith.constant 0 : i32
    %c0_i32_0 = arith.constant 0 : i32
    %c0_i32_1 = arith.constant 0 : i32
    return %c0_i32, %c0_i32_0 : i32, i32
  }
  func.func @transform_6(%arg0: i32, %arg1: i32) -> (i32, i32, i32) {
    %c0_i32 = arith.constant 0 : i32
    %c0_i32_0 = arith.constant 0 : i32
    return %arg0, %c0_i32, %arg1 : i32, i32, i32
  }
}

</mosaic_0001>

<bundles_post_ra>
// kernel: soa_forward.2
= control target key start
LH: loop header
LB: loop body
LE: loop exit
PB: predicated region body
PF: predicated region fallthrough
CT: control target
= control target key end

     0   :  { %s746_s18 = smov 0   ;;  %s748_s19 = smov 0   ;;  %s804_s0 = inlined_call_operand.vmem [shape: f32[2,32,256], index: 0, kind: input, shape index: {}]   ;;  %s805_s1 = inlined_call_operand.vmem [shape: bf16[24,32], index: 1, kind: input, shape index: {}]   ;;  %s806_s2 = inlined_call_operand.vmem [shape: f32[24,1], index: 2, kind: input, shape index: {}]   ;;  %s807_s3 = inlined_call_operand.vmem [shape: bf16[2,8,256], index: 3, kind: output, shape index: {0}]   ;;  %s808_s4 = inlined_call_operand.vmem [shape: bf16[2,8,256], index: 4, kind: output, shape index: {1}]   ;;  %s809_s5 = inlined_call_operand.vmem [shape: bf16[2,8,256], index: 5, kind: output, shape index: {2}]  }
   0x1   :  { %s750_s20 = smov 0  }
   0x2 LB: > { %s28_s21 = sadd.s32 1, %s709_s19  ;;  %p633_p0 = scmp.ge.s32.totalorder %s713_s20, 1  ;;  %s713_s20 = sphi %s750_s20, %s16_s20   ;;  %s709_s19 = sphi %s748_s19, %s811_s19   ;;  %s705_s18 = sphi %s746_s18, %s810_s18  }
   0x3   : > { %p30_p1 = scmp.ge.s32.totalorder %s28_s21, 2  ;;  %p217_p2 = scmp.lt.s32.totalorder %s713_s20, 3 }
   0x5   : > { %s813_s21 = smov (%p30_p1, %s28_s21), 0  ;;  %p218_p3 = pnand %p633_p0, %p217_p2 }
   0x6   : > { %p272_p4 = scmp.lt.s32.totalorder (!%p218_p3), %s705_s18, 1 }
   0x7   : > { %221 = sbr.rel (%p218_p3) target bundleno = 232 (0xe8), region = 32 }
   0xc   : > { %v715_v0 = vmov 0   ;;  %s815_s18 = smov (!%p272_p4, %s705_s18), 1  ;;  %v327_v1 = vld [vmem:[%s806_s2] sm:$0xff]  ;;  %v329_v2 = vld [vmem:[%s806_s2 + $0x10] sm:$0xff]  ;;  %v328_v3 = vld [vmem:[%s806_s2 + $0x8] sm:$0xff]  ;;  %vm353_vm0 = vcmask 261120  }
   0xd   : > { %392 = vmatprep.mubr.bf16.mxu0 %v715_v0  ;;  %402 = vmatprep.mubr.bf16.mxu1 %v715_v0  ;;  %s651_s26 = sshll.u32 %s815_s18, 6  ;;  %v689_v16 = vld [vmem:[%s805_s1] sm:$0xff]   ;;  %v690_v17 = vld [vmem:[%s805_s1 + $0x8] ss:$0 sps:$4 sm:$0xff]   ;;  %s652_s11 = sshll.u32 %s815_s18, 3 }
   0xe   : > { %687 = vset.pattern.permute.xlu0 %v715_v0  ;;  %688 = vset.pattern.permute.xlu1 %v715_v0  ;;  %s279_s6 = scalar_lea.vmem %s804_s0, %s651_s26  ;;  %s309_s14 = scalar_lea.vmem %s809_s5, %s652_s11 }
   0xf   : > { %332 = vperm.xlu0 %687, %v327_v1   ;;  %342 = vperm.xlu1 %688, %v329_v2   ;;  %v317_v4 = vld [vmem:[%s279_s6 + $0x28] sm:$0xff]  ;;  %v319_v5 = vld [vmem:[%s279_s6 + $0x38] sm:$0xff]  ;;  %v316_v6 = vld [vmem:[%s279_s6 + $0x20] sm:$0xff]  ;;  %s289_s17 = scalar_lea.vmem %s807_s3, %s652_s11  ;;  %s299_s23 = scalar_lea.vmem %s808_s4, %s652_s11 }
  0x10   : > { %v323_v7 = vpack.c.bf16 %v319_v5, %v317_v4  ;;  %v318_v8 = vld [vmem:[%s279_s6 + $0x30] sm:$0xff]  ;;  %v313_v9 = vld [vmem:[%s279_s6 + $0x8] sm:$0xff]  ;;  %v315_v10 = vld [vmem:[%s279_s6 + $0x18] sm:$0xff] }
  0x11   : > { %v322_v11 = vpack.c.bf16 %v318_v8, %v316_v6  ;;  %v321_v12 = vpack.c.bf16 %v315_v10, %v313_v9  ;;  %v312_v13 = vld [vmem:[%s279_s6] sm:$0xff]  ;;  %v314_v14 = vld [vmem:[%s279_s6 + $0x10] sm:$0xff] }
  0x12   : > { %372 = vmatprep.subr.bf16.mxu0 %v323_v7  ;;  %658 = vmatprep.subr.bf16.mxu1 %v323_v7  ;;  %v320_v15 = vpack.c.bf16 %v314_v14, %v312_v13 }
  0x13   : > { %337 = vperm.xlu0 %687, %v328_v3   ;;  %373 = vmatpush1.bf16.msra.mxu0 %v322_v11 }
  0x14   : > { %660 = vmatpush1.bf16.msra.mxu1 %v322_v11  ;;  %374 = vmatprep.subr.bf16.mxu0 %v321_v12 }
  0x15   : > { %659 = vmatprep.subr.bf16.mxu1 %v321_v12 }
  0x17   : > { %375 = vmatpush1.bf16.msra.mxu0 %v320_v15 }
  0x18   : > { %661 = vmatpush1.bf16.msra.mxu1 %v320_v15 }
  0x1a   : > { %644 = vmatmul.mubr.msk.bf16.vlgmr.msra.gmra.mxu0 %vm353_vm0, %v689_v16 }
  0x1b   : > { %645 = vmatmul.mubr.msk.bf16.vlgmr.msra.gmra.mxu1 %vm353_vm0, %v690_v17 }
  0x8a   : > { %v333_v18 = vpop.permute.xlu0 %332  ;;  %v343_v19 = vpop.permute.xlu1 %342 }
  0x8e   : > { %v338_v26 = vpop.permute.xlu0 %337 }
  0xda   : > { %v394_v20 = vpop.f32.mrf.mxu0 }
  0xdb   : > { %v404_v21 = vpop.f32.mrf.mxu1  ;;  %v395_v22 = vadd.f32 %v394_v20, %v333_v18 }
  0xdc   : > { %v405_v23 = vadd.f32 %v404_v21, %v343_v19  ;;  %v396_v24 = vpop.f32.mrf.mxu0 }
  0xdd   : > { %v406_v25 = vpop.f32.mrf.mxu1  ;;  %v397_v27 = vadd.f32 %v396_v24, %v333_v18  ;;  %v411_v31 = vmax.f32 %v395_v22, 0.0 }
  0xde   : > { %v407_v28 = vadd.f32 %v406_v25, %v343_v19  ;;  %v398_v29 = vpop.f32.mrf.mxu0 }
  0xdf   : > { %v408_v30 = vpop.f32.mrf.mxu1  ;;  %v412_v32 = vmax.f32 %v397_v27, 0.0  ;;  %v399_v33 = vadd.f32 %v398_v29, %v338_v26 }
  0xe0   : > { %v657_v34 = vpack.c.bf16 %v407_v28, %v405_v23  ;;  %v400_v35 = vpop.f32.mrf.mxu0 }
  0xe1   : > { %v409_v36 = vpop.f32.mrf.mxu1  ;;  %v655_v37 = vpack.c.bf16 %v412_v32, %v411_v31  ;;  %v401_v38 = vadd.f32 %v400_v35, %v338_v26  ;;  %v422_v39 = vmax.f32 %v399_v33, 0.0 }
  0xe2   : > { %441 = vst [vmem:[%s309_s14] sm:$0xff] %v657_v34 }
  0xe3   : > { %421 = vst [vmem:[%s289_s17] sm:$0xff] %v655_v37  ;;  %v423_v40 = vmax.f32 %v401_v38, 0.0 }
  0xe5   : > { %v656_v41 = vpack.c.bf16 %v423_v40, %v422_v39 }
  0xe7   : > { %432 = vst [vmem:[%s299_s23] sm:$0xff] %v656_v41 }
  0xe8 PF: > { %s16_s20 = sadd.s32 1, %s713_s20   ;;  %s810_s18 = smov %s709_s19 }
  0xe9   : > { %p13_p5 = scmp.ge.s32.totalorder %s16_s20, 4   ;;  %s811_s19 = smov %s813_s21 }
  0xeb   :  { %15 = sbr.rel (!%p13_p5) target bundleno = 2 (0x2), region = 86 }

// kernel: soa_forward.3
= control target key start
LH: loop header
LB: loop body
LE: loop exit
PB: predicated region body
PF: predicated region fallthrough
CT: control target
= control target key end

     0   :  { %s1960_s21 = smov 0   ;;  %s1962_s22 = smov 0   ;;  %s2581_s0 = inlined_call_operand.vmem [shape: f32[2,32,256], index: 0, kind: input, shape index: {}]   ;;  %s2582_s1 = inlined_call_operand.vmem [shape: bf16[2,8,256], index: 1, kind: input, shape index: {}]   ;;  %s2583_s2 = inlined_call_operand.vmem [shape: bf16[2,8,256], index: 2, kind: input, shape index: {}]   ;;  %s2584_s3 = inlined_call_operand.vmem [shape: bf16[2,8,256], index: 3, kind: input, shape index: {}]   ;;  %s2585_s4 = inlined_call_operand.vmem [shape: bf16[32,8], index: 4, kind: input, shape index: {}]   ;;  %s2586_s5 = inlined_call_operand.vmem [shape: f32[32,1], index: 5, kind: input, shape index: {}]   ;;  %s2587_s6 = inlined_call_operand.vmem [shape: f32[2,32,256], index: 6, kind: output, shape index: {}]  }
   0x1   :  { %s1964_s23 = smov 0  }
   0x2 LB: > { %s28_s24 = sadd.s32 1, %s1918_s22  ;;  %p1662_p0 = scmp.ge.s32.totalorder %s1922_s23, 1  ;;  %s1922_s23 = sphi %s1964_s23, %s16_s23   ;;  %s1918_s22 = sphi %s1962_s22, %s2634_s22   ;;  %s1914_s21 = sphi %s1960_s21, %s2633_s21  }
   0x3   : > { %p30_p1 = scmp.ge.s32.totalorder %s28_s24, 2  ;;  %p270_p2 = scmp.lt.s32.totalorder %s1922_s23, 3 }
   0x5   : > { %s2636_s24 = smov (%p30_p1, %s28_s24), 0  ;;  %p271_p3 = pnand %p1662_p0, %p270_p2 }
   0x7   : > { %274 = sbr.rel (%p271_p3) target bundleno = 1078 (0x436), region = 44 }
   0xc   : > { %p328_p4 = scmp.lt.s32.totalorder %s1914_s21, 1  ;;  %v1924_v0 = vmov 0   ;;  %vm464_vm0 = vcmask 1043456   ;;  %vm415_vm1 = vcmask 64512  }
   0xd   : > { %503 = vmatprep.mubr.bf16.mxu0 %v1924_v0  ;;  %653 = vmatprep.mubr.bf16.mxu1 %v1924_v0 }
   0xe   : > { %s2638_s21 = smov (!%p328_p4, %s1914_s21), 1  ;;  %1763 = vset.pattern.permute.xlu1 %v1924_v0 }
   0xf   : > { %s1984_s25 = sshll.u32 %s2638_s21, 3  ;;  %s1702_s27 = sshll.u32 %s2638_s21, 6 }
  0x10   : > { %s345_s28 = scalar_lea.vmem %s2582_s1, %s1984_s25  ;;  %s351_s7 = scalar_lea.vmem %s2583_s2, %s1984_s25 }
  0x11   : > { %v368_v1 = vld [vmem:[%s345_s28] sm:$0xff]  ;;  %s356_s10 = scalar_lea.vmem %s2584_s3, %s1984_s25  ;;  %s2549_s30 = scalar_lea.vmem %s2581_s0, %s1702_s27 }
  0x12   : > { %v1673_v2 = vcombine.low %v368_v1, %v368_v1  ;;  %v369_v3 = vld [vmem:[%s351_s7] sm:$0xff]  ;;  %v1674_v7 = vcombine.high %v368_v1, %v368_v1  ;;  %s2555_s9 = scalar_lea.vmem %s2587_s6, %s1702_s27 }
  0x13   : > { %v1676_v4 = vcombine.high %v369_v3, %v369_v3  ;;  %v1675_v5 = vcombine.low %v369_v3, %v369_v3  ;;  %v370_v48 = vld [vmem:[%s356_s10] sm:$0xff] }
  0x14   : > { %378 = vxpose.xlu0.c.b16.start.end [1/1] (short) %v1673_v2, 128  ;;  %v1695_v50 = vcombine.high %v370_v48, %v370_v48  ;;  %v1694_v51 = vcombine.low %v370_v48, %v370_v48 }
  0x15   : > { %1677 = vmatprep.subr.msk.bf16.mxu0 %vm464_vm0, %v1676_v4  ;;  %v466_v6 = vsel %vm464_vm0, %v1675_v5, 0  ;;  %1727 = vmatprep.subr.msk.bf16.mxu1 %vm464_vm0, %v1676_v4 }
  0x16   : > { %486 = vmatpush1.bf16.msra.mxu0 %v466_v6  ;;  %1728 = vmatpush1.bf16.msra.mxu1 %v466_v6 }
  0x17   : > { %1133 = vmatprep.subr.bf16.mxu1 %v1695_v50 }
  0x31   : > { %394 = vxpose.xlu0.c.b16.start.end [1/1] (short) %v1674_v7, 128 }
  0x3a   : > { %1762 = vset.pattern.permute.xlu0 %v1924_v0 }
  0x76   : > { %v386_v8 = vpop.trf.xlu0 }
  0x77   : > { %1678 = vmatmul.mubr.msk.bf16.vlgmr.msra.gmra.mxu0 %vm415_vm1, %v386_v8 }
  0x78   : > { %513 = vmatprep.mubr.bf16.mxu0 %v1924_v0 }
  0x7a   : > { %v387_v9 = vpop.trf.xlu0 }
  0x7e   : > { %v388_v10 = vpop.trf.xlu0 }
  0x7f   : > { %1679 = vmatmul.mubr.msk.bf16.gmra.mxu0 %vm415_vm1, %v387_v9 }
  0x80   : > { %523 = vmatprep.mubr.bf16.mxu0 %v1924_v0 }
  0x82   : > { %v389_v11 = vpop.trf.xlu0 }
  0x86   : > { %v390_v12 = vpop.trf.xlu0 }
  0x87   : > { %1680 = vmatmul.mubr.msk.bf16.gmra.mxu0 %vm415_vm1, %v388_v10 }
  0x88   : > { %533 = vmatprep.mubr.bf16.mxu0 %v1924_v0 }
  0x8a   : > { %v391_v13 = vpop.trf.xlu0 }
  0x8e   : > { %v392_v14 = vpop.trf.xlu0 }
  0x8f   : > { %1681 = vmatmul.mubr.msk.bf16.gmra.mxu0 %vm415_vm1, %v389_v11 }
  0x90   : > { %543 = vmatprep.mubr.bf16.mxu0 %v1924_v0 }
  0x92   : > { %v393_v15 = vpop.trf.xlu0 }
  0x96   : > { %v402_v16 = vpop.trf.xlu0 }
  0x97   : > { %1682 = vmatmul.mubr.msk.bf16.gmra.mxu0 %vm415_vm1, %v390_v12 }
  0x98   : > { %553 = vmatprep.mubr.bf16.mxu0 %v1924_v0 }
  0x9a   : > { %v403_v17 = vpop.trf.xlu0 }
  0x9e   : > { %v404_v18 = vpop.trf.xlu0 }
  0x9f   : > { %1683 = vmatmul.mubr.msk.bf16.gmra.mxu0 %vm415_vm1, %v391_v13 }
  0xa0   : > { %563 = vmatprep.mubr.bf16.mxu0 %v1924_v0 }
  0xa2   : > { %v405_v19 = vpop.trf.xlu0 }
  0xa6   : > { %v406_v20 = vpop.trf.xlu0 }
  0xa7   : > { %1684 = vmatmul.mubr.msk.bf16.gmra.mxu0 %vm415_vm1, %v392_v14 }
  0xa8   : > { %573 = vmatprep.mubr.bf16.mxu0 %v1924_v0 }
  0xaa   : > { %v407_v21 = vpop.trf.xlu0 }
  0xae   : > { %v408_v22 = vpop.trf.xlu0 }
  0xaf   : > { %1685 = vmatmul.mubr.msk.bf16.gmra.mxu0 %vm415_vm1, %v393_v15 }
  0xb0   : > { %583 = vmatprep.mubr.bf16.mxu0 %v1924_v0 }
  0xb2   : > { %v409_v23 = vpop.trf.xlu0 }
  0xb3   : > { %1693 = vmatmul.mubr.msk.bf16.vlgmr.msra.gmra.mxu1 %vm415_vm1, %v409_v23 }
  0xb4   : > { %1134 = vmatpush1.bf16.xpose.msra.mxu1 %v1694_v51 }
  0xb7   : > { %1686 = vmatmul.mubr.msk.bf16.gmra.mxu0 %vm415_vm1, %v402_v16 }
  0xb8   : > { %593 = vmatprep.mubr.bf16.mxu0 %v1924_v0 }
  0xbf   : > { %1687 = vmatmul.mubr.msk.bf16.gmra.mxu0 %vm415_vm1, %v403_v17 }
  0xc0   : > { %603 = vmatprep.mubr.bf16.mxu0 %v1924_v0 }
  0xc7   : > { %1688 = vmatmul.mubr.msk.bf16.gmra.mxu0 %vm415_vm1, %v404_v18 }
  0xc8   : > { %613 = vmatprep.mubr.bf16.mxu0 %v1924_v0 }
  0xcf   : > { %1689 = vmatmul.mubr.msk.bf16.gmra.mxu0 %vm415_vm1, %v405_v19 }
  0xd0   : > { %623 = vmatprep.mubr.bf16.mxu0 %v1924_v0 }
  0xd7   : > { %1690 = vmatmul.mubr.msk.bf16.gmra.mxu0 %vm415_vm1, %v406_v20 }
  0xd8   : > { %633 = vmatprep.mubr.bf16.mxu0 %v1924_v0 }
  0xdf   : > { %1691 = vmatmul.mubr.msk.bf16.gmra.mxu0 %vm415_vm1, %v407_v21 }
  0xe0   : > { %643 = vmatprep.mubr.bf16.mxu0 %v1924_v0 }
  0xe7   : > { %1692 = vmatmul.mubr.msk.bf16.gmra.mxu0 %vm415_vm1, %v408_v22 }
 0x137   : > { %v2025_v24 = vpop.f32.mrf.mxu0 }
 0x139   : > { %v2027_v25 = vpop.f32.mrf.mxu0 }
 0x13a   : > { %v664_v26 = vmax.f32 %v2025_v24, %v2027_v25 }
 0x13b   : > { %v2031_v27 = vpop.f32.mrf.mxu0 }
 0x13c   : > { %665 = vmax.xlane.f32.xlu1 %v664_v26 }
 0x13d   : > { %v2033_v28 = vpop.f32.mrf.mxu0 }
 0x13e   : > { %v667_v29 = vmax.f32 %v2031_v27, %v2033_v28 }
 0x13f   : > { %v2037_v30 = vpop.f32.mrf.mxu0 }
 0x140   : > { %668 = vmax.xlane.f32.xlu1 %v667_v29 }
 0x141   : > { %v2039_v31 = vpop.f32.mrf.mxu0 }
 0x142   : > { %v670_v32 = vmax.f32 %v2037_v30, %v2039_v31 }
 0x143   : > { %v2043_v33 = vpop.f32.mrf.mxu0 }
 0x144   : > { %671 = vmax.xlane.f32.xlu1 %v670_v32 }
 0x145   : > { %v2045_v34 = vpop.f32.mrf.mxu0 }
 0x146   : > { %v673_v35 = vmax.f32 %v2043_v33, %v2045_v34 }
 0x147   : > { %v2049_v36 = vpop.f32.mrf.mxu0 }
 0x148   : > { %674 = vmax.xlane.f32.xlu1 %v673_v35 }
 0x149   : > { %v2051_v37 = vpop.f32.mrf.mxu0 }
 0x14a   : > { %v676_v38 = vmax.f32 %v2049_v36, %v2051_v37 }
 0x14b   : > { %v2055_v39 = vpop.f32.mrf.mxu0 }
 0x14c   : > { %677 = vmax.xlane.f32.xlu1 %v676_v38 }
 0x14d   : > { %v2057_v40 = vpop.f32.mrf.mxu0 }
 0x14e   : > { %v679_v41 = vmax.f32 %v2055_v39, %v2057_v40 }
 0x14f   : > { %v2061_v42 = vpop.f32.mrf.mxu0 }
 0x150   : > { %680 = vmax.xlane.f32.xlu1 %v679_v41 }
 0x151   : > { %v2063_v43 = vpop.f32.mrf.mxu0 }
 0x152   : > { %v682_v44 = vmax.f32 %v2061_v42, %v2063_v43 }
 0x153   : > { %v2067_v45 = vpop.f32.mrf.mxu0 }
 0x154   : > { %683 = vmax.xlane.f32.xlu1 %v682_v44 }
 0x155   : > { %v2069_v46 = vpop.f32.mrf.mxu0 }
 0x156   : > { %v685_v47 = vmax.f32 %v2067_v45, %v2069_v46 }
 0x157   : > { %v2077_v49 = vpop.f32.mrf.mxu0 }
 0x158   : > { %686 = vmax.xlane.f32.xlu1 %v685_v47 }
 0x159   : > { %v2079_v52 = vpop.f32.mrf.mxu0 }
 0x15a   : > { %v688_v53 = vmax.f32 %v2077_v49, %v2079_v52 }
 0x15b   : > { %v2083_v54 = vpop.f32.mrf.mxu0 }
 0x15c   : > { %689 = vmax.xlane.f32.xlu1 %v688_v53 }
 0x15d   : > { %v2085_v55 = vpop.f32.mrf.mxu0 }
 0x15e   : > { %v691_v56 = vmax.f32 %v2083_v54, %v2085_v55 }
 0x15f   : > { %v2089_v57 = vpop.f32.mrf.mxu0 }
 0x160   : > { %692 = vmax.xlane.f32.xlu0 %v691_v56 }
 0x161   : > { %v2091_v58 = vpop.f32.mrf.mxu0 }
 0x162   : > { %v694_v59 = vmax.f32 %v2089_v57, %v2091_v58 }
 0x163   : > { %v2095_v60 = vpop.f32.mrf.mxu0 }
 0x164   : > { %695 = vmax.xlane.f32.xlu1 %v694_v59 }
 0x165   : > { %v2097_v61 = vpop.f32.mrf.mxu0 }
 0x166   : > { %v697_v62 = vmax.f32 %v2095_v60, %v2097_v61 }
 0x167   : > { %v2101_v63 = vpop.f32.mrf.mxu0 }
 0x168   : > { %698 = vmax.xlane.f32.xlu1 %v697_v62 }
 0x169   : > { %v2103_v0 = vpop.f32.mrf.mxu0 }
 0x16a   : > { %v700_v1 = vmax.f32 %v2101_v63, %v2103_v0 }
 0x16b   : > { %v2107_v2 = vpop.f32.mrf.mxu0 }
 0x16c   : > { %701 = vmax.xlane.f32.xlu1 %v700_v1 }
 0x16d   : > { %v2109_v3 = vpop.f32.mrf.mxu0 }
 0x16e   : > { %v703_v4 = vmax.f32 %v2107_v2, %v2109_v3 }
 0x16f   : > { %v2113_v5 = vpop.f32.mrf.mxu0 }
 0x170   : > { %704 = vmax.xlane.f32.xlu1 %v703_v4 }
 0x171   : > { %v2115_v6 = vpop.f32.mrf.mxu0 }
 0x172   : > { %v706_v7 = vmax.f32 %v2113_v5, %v2115_v6 }
 0x173   : > { %v2119_v8 = vpop.f32.mrf.mxu0 }
 0x174   : > { %707 = vmax.xlane.f32.xlu1 %v706_v7 }
 0x175   : > { %v2121_v9 = vpop.f32.mrf.mxu0 }
 0x176   : > { %v709_v10 = vmax.f32 %v2119_v8, %v2121_v9 }
 0x177   : > { %v2125_v11 = vpop.f32.mrf.mxu0 }
 0x178   : > { %710 = vmax.xlane.f32.xlu1 %v709_v10 }
 0x179   : > { %v2127_v12 = vpop.f32.mrf.mxu0 }
 0x17a   : > { %v712_v13 = vmax.f32 %v2125_v11, %v2127_v12 }
 0x17b   : > { %v2131_v14 = vpop.f32.mrf.mxu0 }
 0x17c   : > { %713 = vmax.xlane.f32.xlu1 %v712_v13 }
 0x17d   : > { %v2133_v15 = vpop.f32.mrf.mxu0 }
 0x17e   : > { %v715_v16 = vmax.f32 %v2131_v14, %v2133_v15 }
 0x17f   : > { %v2137_v17 = vpop.f32.mrf.mxu0 }
 0x180   : > { %716 = vmax.xlane.f32.xlu1 %v715_v16 }
 0x181   : > { %v2139_v18 = vpop.f32.mrf.mxu0 }
 0x182   : > { %v718_v19 = vmax.f32 %v2137_v17, %v2139_v18 }
 0x183   : > { %v2143_v20 = vpop.f32.mrf.mxu0 }
 0x184   : > { %719 = vmax.xlane.f32.xlu1 %v718_v19  ;;  %v2193_v19 = vpop.f32.mrf.mxu1 }
 0x185   : > { %v2145_v21 = vpop.f32.mrf.mxu0  ;;  %2609 = vst [vmem:[#allocation8_spill] sm:$0xff] %v2193_v19 }
 0x186   : > { %v721_v22 = vmax.f32 %v2143_v20, %v2145_v21 }
 0x187   : > { %v2149_v23 = vpop.f32.mrf.mxu0 }
 0x188   : > { %722 = vmax.xlane.f32.xlu1 %v721_v22 }
 0x189   : > { %v2151_v26 = vpop.f32.mrf.mxu0 }
 0x18a   : > { %v724_v29 = vmax.f32 %v2149_v23, %v2151_v26 }
 0x18b   : > { %v2155_v32 = vpop.f32.mrf.mxu0 }
 0x18c   : > { %725 = vmax.xlane.f32.xlu0 %v724_v29 }
 0x18d   : > { %v2157_v35 = vpop.f32.mrf.mxu0 }
 0x18e   : > { %v727_v38 = vmax.f32 %v2155_v32, %v2157_v35 }
 0x18f   : > { %v2161_v41 = vpop.f32.mrf.mxu0 }
 0x190   : > { %728 = vmax.xlane.f32.xlu1 %v727_v38 }
 0x191   : > { %v2163_v44 = vpop.f32.mrf.mxu0 }
 0x192   : > { %v730_v47 = vmax.f32 %v2161_v41, %v2163_v44 }
 0x193   : > { %v2167_v48 = vpop.f32.mrf.mxu0 }
 0x194   : > { %731 = vmax.xlane.f32.xlu0 %v730_v47  ;;  %v2201_v47 = vpop.f32.mrf.mxu1 }
 0x195   : > { %v2169_v50 = vpop.f32.mrf.mxu0  ;;  %2612 = vst [vmem:[#allocation11_spill] sm:$0xff] %v2201_v47 }
 0x196   : > { %v733_v51 = vmax.f32 %v2167_v48, %v2169_v50 }
 0x197   : > { %v2173_v53 = vpop.f32.mrf.mxu0 }
 0x198   : > { %734 = vmax.xlane.f32.xlu1 %v733_v51 }
 0x199   : > { %v2175_v56 = vpop.f32.mrf.mxu0 }
 0x19a   : > { %2603 = vst [vmem:[#allocation2_spill] sm:$0xff] %v2175_v56  ;;  %v736_v59 = vmax.f32 %v2173_v53, %v2175_v56 }
 0x19b   : > { %v2179_v62 = vpop.f32.mrf.mxu0 }
 0x19c   : > { %2604 = vst [vmem:[#allocation3_spill] sm:$0xff] %v2179_v62  ;;  %737 = vmax.xlane.f32.xlu0 %v736_v59 }
 0x19d   : > { %v2181_v1 = vpop.f32.mrf.mxu0 }
 0x19e   : > { %2605 = vst [vmem:[#allocation4_spill] sm:$0xff] %v2181_v1  ;;  %v739_v4 = vmax.f32 %v2179_v62, %v2181_v1 }
 0x19f   : > { %v2185_v7 = vpop.f32.mrf.mxu0 }
 0x1a0   : > { %2606 = vst [vmem:[#allocation5_spill] sm:$0xff] %v2185_v7  ;;  %740 = vmax.xlane.f32.xlu1 %v739_v4 }
 0x1a1   : > { %v2187_v10 = vpop.f32.mrf.mxu0 }
 0x1a2   : > { %2607 = vst [vmem:[#allocation6_spill] sm:$0xff] %v2187_v10  ;;  %v742_v13 = vmax.f32 %v2185_v7, %v2187_v10  ;;  %v2209_v10 = vpop.f32.mrf.mxu1 }
 0x1a3   : > { %v2191_v16 = vpop.f32.mrf.mxu0  ;;  %2615 = vst [vmem:[#allocation14_spill] sm:$0xff] %v2209_v10 }
 0x1a4   : > { %2608 = vst [vmem:[#allocation7_spill] sm:$0xff] %v2191_v16  ;;  %743 = vmax.xlane.f32.xlu0 %v742_v13  ;;  %v754_v13 = vmax.f32 %v2193_v19, %v2201_v47 }
 0x1a5   : > { %v2195_v22 = vpop.f32.mrf.mxu0 }
 0x1a6   : > { %2610 = vst [vmem:[#allocation9_spill] sm:$0xff] %v2195_v22  ;;  %v745_v29 = vmax.f32 %v2191_v16, %v2195_v22  ;;  %v2217_v16 = vpop.f32.mrf.mxu1 }
 0x1a7   : > { %v2199_v38 = vpop.f32.mrf.mxu0  ;;  %2617 = vst [vmem:[#allocation16_spill] sm:$0xff] %v2217_v16 }
 0x1a8   : > { %2611 = vst [vmem:[#allocation10_spill] sm:$0xff] %v2199_v38  ;;  %746 = vmax.xlane.f32.xlu1 %v745_v29  ;;  %v757_v29 = vmax.f32 %v2209_v10, %v2217_v16 }
 0x1a9   : > { %v2203_v51 = vpop.f32.mrf.mxu0 }
 0x1aa   : > { %2613 = vst [vmem:[#allocation12_spill] sm:$0xff] %v2203_v51  ;;  %v748_v59 = vmax.f32 %v2199_v38, %v2203_v51 }
 0x1ab   : > { %v2207_v4 = vpop.f32.mrf.mxu0 }
 0x1ac   : > { %2614 = vst [vmem:[#allocation13_spill] sm:$0xff] %v2207_v4  ;;  %749 = vmax.xlane.f32.xlu0 %v748_v59 }
 0x1ad   : > { %v2213_v7 = vpop.f32.mrf.mxu0 }
 0x1ae   : > { %2616 = vst [vmem:[#allocation15_spill] sm:$0xff] %v2213_v7  ;;  %v751_v22 = vmax.f32 %v2207_v4, %v2213_v7 }
 0x1b0   : > { %752 = vmax.xlane.f32.xlu1 %v751_v22  ;;  %755 = vmax.xlane.f32.xlu0 %v754_v13 }
 0x1b4   : > { %758 = vmax.xlane.f32.xlu1 %v757_v29 }
 0x1c5   : > { %v666_v51 = vpop.xlane.xlu1 %665 }
 0x1c6   : > { %v760_v59 = vsub.f32 %v2025_v24, %v666_v51  ;;  %v761_v1 = vsub.f32 %v2027_v25, %v666_v51 }
 0x1c9   : > { %v669_v38 = vpop.xlane.xlu1 %668 }
 0x1ca   : > { %v762_v47 = vsub.f32 %v2031_v27, %v669_v38  ;;  %v763_v19 = vsub.f32 %v2033_v28, %v669_v38 }
 0x1cc   : > { %v824_v62 = vpack.c.bf16 %v762_v47, %v760_v59  ;;  %v825_v7 = vpack.c.bf16 %v763_v19, %v761_v1 }
 0x1cd   : > { %v672_v4 = vpop.xlane.xlu1 %671 }
 0x1ce   : > { %v857_v56 = vmul.bf16 1069105081, %v824_v62  ;;  %v860_v22 = vmul.bf16 1069105081, %v825_v7  ;;  %v764_v29 = vsub.f32 %v2037_v30, %v672_v4  ;;  %v765_v16 = vsub.f32 %v2039_v31, %v672_v4 }
 0x1d0   : > { %1772 = vpow.bf16 %v857_v56 }
 0x1d1   : > { %1774 = vpow.bf16 %v860_v22  ;;  %v675_v13 = vpop.xlane.xlu1 %674 }
 0x1d2   : > { %v766_v24 = vsub.f32 %v2043_v33, %v675_v13  ;;  %v767_v25 = vsub.f32 %v2045_v34, %v675_v13 }
 0x1d4   : > { %v826_v51 = vpack.c.bf16 %v766_v24, %v764_v29  ;;  %v827_v27 = vpack.c.bf16 %v767_v25, %v765_v16 }
 0x1d5   : > { %v678_v10 = vpop.xlane.xlu1 %677 }
 0x1d6   : > { %v863_v28 = vmul.bf16 1069105081, %v826_v51  ;;  %v866_v38 = vmul.bf16 1069105081, %v827_v27  ;;  %v768_v56 = vsub.f32 %v2049_v36, %v678_v10  ;;  %v769_v1 = vsub.f32 %v2051_v37, %v678_v10 }
 0x1d8   : > { %1776 = vpow.bf16 %v863_v28 }
 0x1d9   : > { %1778 = vpow.bf16 %v866_v38  ;;  %v681_v62 = vpop.xlane.xlu1 %680 }
 0x1da   : > { %v770_v30 = vsub.f32 %v2055_v39, %v681_v62  ;;  %v771_v31 = vsub.f32 %v2057_v40, %v681_v62 }
 0x1dc   : > { %v828_v7 = vpack.c.bf16 %v770_v30, %v768_v56  ;;  %v829_v33 = vpack.c.bf16 %v771_v31, %v769_v1 }
 0x1dd   : > { %v684_v19 = vpop.xlane.xlu1 %683 }
 0x1de   : > { %v1773_v34 = vpop.eup %1772  ;;  %v869_v47 = vmul.bf16 1069105081, %v828_v7  ;;  %v872_v16 = vmul.bf16 1069105081, %v829_v33  ;;  %v772_v36 = vsub.f32 %v2061_v42, %v684_v19  ;;  %v773_v37 = vsub.f32 %v2063_v43, %v684_v19 }
 0x1df   : > { %v1775_v4 = vpop.eup %1774  ;;  %v954_v59 = vunpack.c.h.bf16 %v1773_v34  ;;  %v952_v22 = vunpack.c.l.bf16 %v1773_v34 }
 0x1e0   : > { %1780 = vpow.bf16 %v869_v47  ;;  %1151 = vmatprep.mubr.bf16.mxu1 %v1775_v4  ;;  %v955_v13 = vunpack.c.h.bf16 %v1775_v4  ;;  %v953_v29 = vunpack.c.l.bf16 %v1775_v4 }
 0x1e1   : > { %1782 = vpow.bf16 %v872_v16  ;;  %1152 = vmatmul.mubr.bf16.vlgmr.msra.gmra.mxu1 %v1773_v34  ;;  %v687_v39 = vpop.xlane.xlu1 %686 }
 0x1e2   : > { %v774_v40 = vsub.f32 %v2067_v45, %v687_v39  ;;  %v775_v10 = vsub.f32 %v2069_v46, %v687_v39  ;;  %v2237_v24 = vadd.f32 %v955_v13, %v954_v59  ;;  %v2239_v25 = vadd.f32 %v953_v29, %v952_v22 }
 0x1e4   : > { %v830_v51 = vpack.c.bf16 %v774_v40, %v772_v36  ;;  %v831_v27 = vpack.c.bf16 %v775_v10, %v773_v37 }
 0x1e5   : > { %v690_v56 = vpop.xlane.xlu1 %689 }
 0x1e6   : > { %v1777_v28 = vpop.eup %1776  ;;  %v875_v38 = vmul.bf16 1069105081, %v830_v51  ;;  %v878_v62 = vmul.bf16 1069105081, %v831_v27  ;;  %v776_v45 = vsub.f32 %v2077_v49, %v690_v56  ;;  %v777_v46 = vsub.f32 %v2079_v52, %v690_v56 }
 0x1e7   : > { %v1779_v1 = vpop.eup %1778  ;;  %v958_v42 = vunpack.c.h.bf16 %v1777_v28  ;;  %v956_v30 = vunpack.c.l.bf16 %v1777_v28 }
 0x1e8   : > { %1784 = vpow.bf16 %v875_v38  ;;  %1159 = vmatprep.mubr.bf16.mxu1 %v1779_v1  ;;  %v959_v43 = vunpack.c.h.bf16 %v1779_v1  ;;  %v957_v31 = vunpack.c.l.bf16 %v1779_v1 }
 0x1e9   : > { %1786 = vpow.bf16 %v878_v62  ;;  %1160 = vmatmul.mubr.bf16.gmra.mxu1 %v1777_v28  ;;  %v693_v7 = vpop.xlane.xlu0 %692 }
 0x1ea   : > { %v778_v33 = vsub.f32 %v2083_v54, %v693_v7  ;;  %v779_v19 = vsub.f32 %v2085_v55, %v693_v7  ;;  %v2245_v34 = vadd.f32 %v959_v43, %v958_v42  ;;  %v2247_v47 = vadd.f32 %v957_v31, %v956_v30 }
 0x1ec   : > { %v832_v16 = vpack.c.bf16 %v778_v33, %v776_v45  ;;  %v833_v4 = vpack.c.bf16 %v779_v19, %v777_v46 }
 0x1ed   : > { %v696_v59 = vpop.xlane.xlu1 %695 }
 0x1ee   : > { %v1781_v22 = vpop.eup %1780  ;;  %v881_v13 = vmul.bf16 1069105081, %v832_v16  ;;  %v884_v29 = vmul.bf16 1069105081, %v833_v4  ;;  %v780_v54 = vsub.f32 %v2089_v57, %v696_v59  ;;  %v781_v55 = vsub.f32 %v2091_v58, %v696_v59 }
 0x1ef   : > { %v1783_v36 = vpop.eup %1782  ;;  %v962_v49 = vunpack.c.h.bf16 %v1781_v22  ;;  %v960_v37 = vunpack.c.l.bf16 %v1781_v22 }
 0x1f0   : > { %1788 = vpow.bf16 %v881_v13  ;;  %1167 = vmatprep.mubr.bf16.mxu1 %v1783_v36  ;;  %v963_v52 = vunpack.c.h.bf16 %v1783_v36  ;;  %v961_v39 = vunpack.c.l.bf16 %v1783_v36 }
 0x1f1   : > { %1790 = vpow.bf16 %v884_v29  ;;  %1168 = vmatmul.mubr.bf16.gmra.mxu1 %v1781_v22  ;;  %v699_v40 = vpop.xlane.xlu1 %698 }
 0x1f2   : > { %v782_v10 = vsub.f32 %v2095_v60, %v699_v40  ;;  %v783_v51 = vsub.f32 %v2097_v61, %v699_v40  ;;  %v2253_v27 = vadd.f32 %v963_v52, %v962_v49  ;;  %v2255_v28 = vadd.f32 %v961_v39, %v960_v37 }
 0x1f4   : > { %v834_v38 = vpack.c.bf16 %v782_v10, %v780_v54  ;;  %v835_v62 = vpack.c.bf16 %v783_v51, %v781_v55 }
 0x1f5   : > { %v702_v56 = vpop.xlane.xlu1 %701 }
 0x1f6   : > { %v1785_v1 = vpop.eup %1784  ;;  %v887_v42 = vmul.bf16 1069105081, %v834_v38  ;;  %v890_v30 = vmul.bf16 1069105081, %v835_v62  ;;  %v784_v60 = vsub.f32 %v2101_v63, %v702_v56  ;;  %v785_v61 = vsub.f32 %v2103_v0, %v702_v56 }
 0x1f7   : > { %v1787_v43 = vpop.eup %1786  ;;  %v966_v57 = vunpack.c.h.bf16 %v1785_v1  ;;  %v964_v31 = vunpack.c.l.bf16 %v1785_v1 }
 0x1f8   : > { %1792 = vpow.bf16 %v887_v42  ;;  %1175 = vmatprep.mubr.bf16.mxu1 %v1787_v43  ;;  %v967_v58 = vunpack.c.h.bf16 %v1787_v43  ;;  %v965_v45 = vunpack.c.l.bf16 %v1787_v43 }
 0x1f9   : > { %1794 = vpow.bf16 %v890_v30  ;;  %1176 = vmatmul.mubr.bf16.gmra.mxu1 %v1785_v1  ;;  %v705_v46 = vpop.xlane.xlu1 %704 }
 0x1fa   : > { %v786_v7 = vsub.f32 %v2107_v2, %v705_v46  ;;  %v787_v33 = vsub.f32 %v2109_v3, %v705_v46  ;;  %v2261_v19 = vadd.f32 %v967_v58, %v966_v57  ;;  %v2263_v16 = vadd.f32 %v965_v45, %v964_v31 }
 0x1fc   : > { %v836_v4 = vpack.c.bf16 %v786_v7, %v784_v60  ;;  %v837_v59 = vpack.c.bf16 %v787_v33, %v785_v61 }
 0x1fd   : > { %v708_v22 = vpop.xlane.xlu1 %707 }
 0x1fe   : > { %v1789_v13 = vpop.eup %1788  ;;  %v893_v29 = vmul.bf16 1069105081, %v836_v4  ;;  %v896_v36 = vmul.bf16 1069105081, %v837_v59  ;;  %v788_v2 = vsub.f32 %v2113_v5, %v708_v22  ;;  %v789_v3 = vsub.f32 %v2115_v6, %v708_v22 }
 0x1ff   : > { %v1791_v49 = vpop.eup %1790  ;;  %v970_v63 = vunpack.c.h.bf16 %v1789_v13  ;;  %v968_v37 = vunpack.c.l.bf16 %v1789_v13 }
 0x200   : > { %1796 = vpow.bf16 %v893_v29  ;;  %1183 = vmatprep.mubr.bf16.mxu1 %v1791_v49  ;;  %v971_v0 = vunpack.c.h.bf16 %v1791_v49  ;;  %v969_v52 = vunpack.c.l.bf16 %v1791_v49 }
 0x201   : > { %1798 = vpow.bf16 %v896_v36  ;;  %1184 = vmatmul.mubr.bf16.gmra.mxu1 %v1789_v13  ;;  %v711_v39 = vpop.xlane.xlu1 %710 }
 0x202   : > { %v790_v54 = vsub.f32 %v2119_v8, %v711_v39  ;;  %v791_v55 = vsub.f32 %v2121_v9, %v711_v39  ;;  %v2269_v40 = vadd.f32 %v971_v0, %v970_v63  ;;  %v2271_v10 = vadd.f32 %v969_v52, %v968_v37 }
 0x204   : > { %v838_v51 = vpack.c.bf16 %v790_v54, %v788_v2  ;;  %v839_v38 = vpack.c.bf16 %v791_v55, %v789_v3 }
 0x205   : > { %v714_v62 = vpop.xlane.xlu1 %713 }
 0x206   : > { %v1793_v56 = vpop.eup %1792  ;;  %v899_v1 = vmul.bf16 1069105081, %v838_v51  ;;  %v902_v42 = vmul.bf16 1069105081, %v839_v38  ;;  %v792_v8 = vsub.f32 %v2125_v11, %v714_v62  ;;  %v793_v9 = vsub.f32 %v2127_v12, %v714_v62 }
 0x207   : > { %v1795_v30 = vpop.eup %1794  ;;  %v974_v5 = vunpack.c.h.bf16 %v1793_v56  ;;  %v972_v43 = vunpack.c.l.bf16 %v1793_v56 }
 0x208   : > { %1800 = vpow.bf16 %v899_v1  ;;  %1191 = vmatprep.mubr.bf16.mxu1 %v1795_v30  ;;  %v975_v6 = vunpack.c.h.bf16 %v1795_v30  ;;  %v973_v57 = vunpack.c.l.bf16 %v1795_v30 }
 0x209   : > { %1802 = vpow.bf16 %v902_v42  ;;  %1192 = vmatmul.mubr.bf16.gmra.mxu1 %v1793_v56  ;;  %v717_v31 = vpop.xlane.xlu1 %716 }
 0x20a   : > { %v794_v58 = vsub.f32 %v2131_v14, %v717_v31  ;;  %v795_v45 = vsub.f32 %v2133_v15, %v717_v31  ;;  %v2277_v60 = vadd.f32 %v975_v6, %v974_v5  ;;  %v2279_v61 = vadd.f32 %v973_v57, %v972_v43 }
 0x20c   : > { %v840_v46 = vpack.c.bf16 %v794_v58, %v792_v8  ;;  %v841_v7 = vpack.c.bf16 %v795_v45, %v793_v9 }
 0x20d   : > { %v720_v33 = vpop.xlane.xlu1 %719 }
 0x20e   : > { %v1797_v4 = vpop.eup %1796  ;;  %v905_v59 = vmul.bf16 1069105081, %v840_v46  ;;  %v908_v22 = vmul.bf16 1069105081, %v841_v7  ;;  %v796_v14 = vsub.f32 %v2137_v17, %v720_v33  ;;  %v797_v15 = vsub.f32 %v2139_v18, %v720_v33 }
 0x20f   : > { %v1799_v13 = vpop.eup %1798  ;;  %v978_v11 = vunpack.c.h.bf16 %v1797_v4  ;;  %v976_v29 = vunpack.c.l.bf16 %v1797_v4 }
 0x210   : > { %1804 = vpow.bf16 %v905_v59  ;;  %1199 = vmatprep.mubr.bf16.mxu1 %v1799_v13  ;;  %v979_v12 = vunpack.c.h.bf16 %v1799_v13  ;;  %v977_v36 = vunpack.c.l.bf16 %v1799_v13 }
 0x211   : > { %1806 = vpow.bf16 %v908_v22  ;;  %1200 = vmatmul.mubr.bf16.gmra.mxu1 %v1797_v4  ;;  %v723_v49 = vpop.xlane.xlu1 %722 }
 0x212   : > { %v798_v63 = vsub.f32 %v2143_v20, %v723_v49  ;;  %v799_v37 = vsub.f32 %v2145_v21, %v723_v49  ;;  %v2285_v0 = vadd.f32 %v979_v12, %v978_v11  ;;  %v2287_v52 = vadd.f32 %v977_v36, %v976_v29 }
 0x214   : > { %v842_v2 = vpack.c.bf16 %v798_v63, %v796_v14  ;;  %v843_v3 = vpack.c.bf16 %v799_v37, %v797_v15 }
 0x215   : > { %v726_v51 = vpop.xlane.xlu0 %725 }
 0x216   : > { %v1801_v39 = vpop.eup %1800  ;;  %v911_v54 = vmul.bf16 1069105081, %v842_v2  ;;  %v914_v55 = vmul.bf16 1069105081, %v843_v3  ;;  %v800_v20 = vsub.f32 %v2149_v23, %v726_v51  ;;  %v801_v21 = vsub.f32 %v2151_v26, %v726_v51 }
 0x217   : > { %v1803_v38 = vpop.eup %1802  ;;  %v982_v17 = vunpack.c.h.bf16 %v1801_v39  ;;  %v980_v62 = vunpack.c.l.bf16 %v1801_v39 }
 0x218   : > { %1808 = vpow.bf16 %v911_v54  ;;  %1207 = vmatprep.mubr.bf16.mxu1 %v1803_v38  ;;  %v983_v18 = vunpack.c.h.bf16 %v1803_v38  ;;  %v981_v56 = vunpack.c.l.bf16 %v1803_v38 }
 0x219   : > { %1810 = vpow.bf16 %v914_v55  ;;  %1208 = vmatmul.mubr.bf16.gmra.mxu1 %v1801_v39  ;;  %v729_v1 = vpop.xlane.xlu1 %728  ;;  %v2619_v39 = vld [vmem:[#allocation3_spill] sm:$0xff]  ;;  %v2620_v55 = vld [vmem:[#allocation4_spill] sm:$0xff] }
 0x21a   : > { %v802_v42 = vsub.f32 %v2155_v32, %v729_v1  ;;  %v803_v30 = vsub.f32 %v2157_v35, %v729_v1  ;;  %v2293_v5 = vadd.f32 %v983_v18, %v982_v17  ;;  %v2295_v43 = vadd.f32 %v981_v56, %v980_v62 }
 0x21c   : > { %v844_v6 = vpack.c.bf16 %v802_v42, %v800_v20  ;;  %v845_v57 = vpack.c.bf16 %v803_v30, %v801_v21 }
 0x21d   : > { %v732_v58 = vpop.xlane.xlu0 %731 }
 0x21e   : > { %v1805_v8 = vpop.eup %1804  ;;  %v917_v9 = vmul.bf16 1069105081, %v844_v6  ;;  %v920_v31 = vmul.bf16 1069105081, %v845_v57  ;;  %v804_v32 = vsub.f32 %v2161_v41, %v732_v58  ;;  %v805_v35 = vsub.f32 %v2163_v44, %v732_v58 }
 0x21f   : > { %v1807_v45 = vpop.eup %1806  ;;  %v986_v23 = vunpack.c.h.bf16 %v1805_v8  ;;  %v984_v46 = vunpack.c.l.bf16 %v1805_v8 }
 0x220   : > { %1812 = vpow.bf16 %v917_v9  ;;  %1215 = vmatprep.mubr.bf16.mxu1 %v1807_v45  ;;  %v987_v26 = vunpack.c.h.bf16 %v1807_v45  ;;  %v985_v7 = vunpack.c.l.bf16 %v1807_v45 }
 0x221   : > { %1814 = vpow.bf16 %v920_v31  ;;  %1216 = vmatmul.mubr.bf16.gmra.mxu1 %v1805_v8  ;;  %v735_v33 = vpop.xlane.xlu1 %734  ;;  %v2621_v8 = vld [vmem:[#allocation5_spill] sm:$0xff]  ;;  %v2622_v31 = vld [vmem:[#allocation6_spill] sm:$0xff] }
 0x222   : > { %v806_v4 = vsub.f32 %v2167_v48, %v735_v33  ;;  %v807_v59 = vsub.f32 %v2169_v50, %v735_v33  ;;  %v2301_v22 = vadd.f32 %v987_v26, %v986_v23  ;;  %v2303_v13 = vadd.f32 %v985_v7, %v984_v46  ;;  %v2618_v50 = vld [vmem:[#allocation2_spill] sm:$0xff]  ;;  %v2623_v23 = vld [vmem:[#allocation7_spill] sm:$0xff]  ;;  %v2624_v26 = vld [vmem:[#allocation9_spill] sm:$0xff] }
 0x224   : > { %v846_v11 = vpack.c.bf16 %v806_v4, %v804_v32  ;;  %v847_v29 = vpack.c.bf16 %v807_v59, %v805_v35 }
 0x225   : > { %v738_v15 = vpop.xlane.xlu0 %737 }
 0x226   : > { %v1809_v12 = vpop.eup %1808  ;;  %v923_v36 = vmul.bf16 1069105081, %v846_v11  ;;  %v926_v14 = vmul.bf16 1069105081, %v847_v29  ;;  %v808_v48 = vsub.f32 %v2173_v53, %v738_v15  ;;  %v809_v2 = vsub.f32 %v2618_v50, %v738_v15 }
 0x227   : > { %v1811_v49 = vpop.eup %1810  ;;  %v990_v41 = vunpack.c.h.bf16 %v1809_v12  ;;  %v988_v63 = vunpack.c.l.bf16 %v1809_v12 }
 0x228   : > { %1816 = vpow.bf16 %v923_v36  ;;  %1223 = vmatprep.mubr.bf16.mxu1 %v1811_v49  ;;  %v991_v44 = vunpack.c.h.bf16 %v1811_v49  ;;  %v989_v37 = vunpack.c.l.bf16 %v1811_v49 }
 0x229   : > { %1818 = vpow.bf16 %v926_v14  ;;  %1224 = vmatmul.mubr.bf16.gmra.mxu1 %v1809_v12  ;;  %v741_v3 = vpop.xlane.xlu1 %740 }
 0x22a   : > { %v810_v54 = vsub.f32 %v2619_v39, %v741_v3  ;;  %v811_v51 = vsub.f32 %v2620_v55, %v741_v3  ;;  %v2309_v38 = vadd.f32 %v991_v44, %v990_v41  ;;  %v2311_v17 = vadd.f32 %v989_v37, %v988_v63  ;;  %v2625_v44 = vld [vmem:[#allocation10_spill] sm:$0xff]  ;;  %v2628_v39 = vld [vmem:[#allocation15_spill] sm:$0xff] }
 0x22c   : > { %v848_v62 = vpack.c.bf16 %v810_v54, %v808_v48  ;;  %v849_v18 = vpack.c.bf16 %v811_v51, %v809_v2  ;;  %v2626_v48 = vld [vmem:[#allocation12_spill] sm:$0xff]  ;;  %v2627_v2 = vld [vmem:[#allocation13_spill] sm:$0xff] }
 0x22d   : > { %v744_v1 = vpop.xlane.xlu0 %743 }
 0x22e   : > { %v1813_v56 = vpop.eup %1812  ;;  %v929_v20 = vmul.bf16 1069105081, %v848_v62  ;;  %v932_v21 = vmul.bf16 1069105081, %v849_v18  ;;  %v812_v9 = vsub.f32 %v2621_v8, %v744_v1  ;;  %v813_v58 = vsub.f32 %v2622_v31, %v744_v1  ;;  %v2630_v1 = vld [vmem:[#allocation11_spill] sm:$0xff]  ;;  %v2631_v8 = vld [vmem:[#allocation14_spill] sm:$0xff] }
 0x22f   : > { %v1815_v42 = vpop.eup %1814  ;;  %v994_v53 = vunpack.c.h.bf16 %v1813_v56  ;;  %v992_v30 = vunpack.c.l.bf16 %v1813_v56  ;;  %v2632_v31 = vld [vmem:[#allocation16_spill] sm:$0xff] }
 0x230   : > { %1820 = vpow.bf16 %v929_v20  ;;  %1231 = vmatprep.mubr.bf16.mxu1 %v1815_v42  ;;  %v995_v6 = vunpack.c.h.bf16 %v1815_v42  ;;  %v993_v57 = vunpack.c.l.bf16 %v1815_v42  ;;  %v2629_v20 = vld [vmem:[#allocation8_spill] sm:$0xff] }
 0x231   : > { %1822 = vpow.bf16 %v932_v21  ;;  %1232 = vmatmul.mubr.bf16.gmra.mxu1 %v1813_v56  ;;  %v747_v45 = vpop.xlane.xlu1 %746 }
 0x232   : > { %v814_v46 = vsub.f32 %v2623_v23, %v747_v45  ;;  %v815_v7 = vsub.f32 %v2624_v26, %v747_v45  ;;  %v2317_v32 = vadd.f32 %v995_v6, %v994_v53  ;;  %v2319_v35 = vadd.f32 %v993_v57, %v992_v30 }
 0x234   : > { %v850_v33 = vpack.c.bf16 %v814_v46, %v812_v9  ;;  %v851_v4 = vpack.c.bf16 %v815_v7, %v813_v58 }
 0x235   : > { %v750_v59 = vpop.xlane.xlu0 %749 }
 0x236   : > { %v1817_v11 = vpop.eup %1816  ;;  %v935_v29 = vmul.bf16 1069105081, %v850_v33  ;;  %v938_v12 = vmul.bf16 1069105081, %v851_v4  ;;  %v816_v37 = vsub.f32 %v2625_v44, %v750_v59  ;;  %v817_v50 = vsub.f32 %v2626_v48, %v750_v59 }
 0x237   : > { %v1819_v36 = vpop.eup %1818  ;;  %v998_v14 = vunpack.c.h.bf16 %v1817_v11  ;;  %v996_v15 = vunpack.c.l.bf16 %v1817_v11 }
 0x238   : > { %1824 = vpow.bf16 %v935_v29  ;;  %1239 = vmatprep.mubr.bf16.mxu1 %v1819_v36  ;;  %v999_v49 = vunpack.c.h.bf16 %v1819_v36  ;;  %v997_v41 = vunpack.c.l.bf16 %v1819_v36 }
 0x239   : > { %1826 = vpow.bf16 %v938_v12  ;;  %1240 = vmatmul.mubr.bf16.gmra.mxu1 %v1817_v11  ;;  %v753_v63 = vpop.xlane.xlu1 %752  ;;  %v756_v55 = vpop.xlane.xlu0 %755 }
 0x23a   : > { %v818_v3 = vsub.f32 %v2627_v2, %v753_v63  ;;  %v819_v54 = vsub.f32 %v2628_v39, %v753_v63  ;;  %v2325_v51 = vadd.f32 %v999_v49, %v998_v14  ;;  %v2327_v62 = vadd.f32 %v997_v41, %v996_v15 }
 0x23b   : > { %v820_v21 = vsub.f32 %v2629_v20, %v756_v55  ;;  %v821_v42 = vsub.f32 %v2630_v1, %v756_v55 }
 0x23c   : > { %v852_v18 = vpack.c.bf16 %v818_v3, %v816_v37  ;;  %v853_v56 = vpack.c.bf16 %v819_v54, %v817_v50 }
 0x23d   : > { %v759_v53 = vpop.xlane.xlu1 %758 }
 0x23e   : > { %v2331_v30 = vpop.eup %1820  ;;  %v941_v6 = vmul.bf16 1069105081, %v852_v18  ;;  %v944_v57 = vmul.bf16 1069105081, %v853_v56  ;;  %v822_v9 = vsub.f32 %v2631_v8, %v759_v53  ;;  %v823_v58 = vsub.f32 %v2632_v31, %v759_v53 }
 0x23f   : > { %v1823_v45 = vpop.eup %1822 }
 0x240   : > { %1828 = vpow.bf16 %v941_v6  ;;  %v854_v23 = vpack.c.bf16 %v822_v9, %v820_v21  ;;  %v855_v46 = vpack.c.bf16 %v823_v58, %v821_v42  ;;  %1247 = vmatprep.mubr.bf16.mxu1 %v1823_v45  ;;  %v1003_v56 = vunpack.c.h.bf16 %v1823_v45 }
 0x241   : > { %1830 = vpow.bf16 %v944_v57  ;;  %1248 = vmatmul.mubr.bf16.gmra.mxu1 %v2331_v30  ;;  %v1001_v20 = vunpack.c.l.bf16 %v1823_v45 }
 0x242   : > { %v947_v26 = vmul.bf16 1069105081, %v854_v23  ;;  %v950_v7 = vmul.bf16 1069105081, %v855_v46  ;;  %v2389_v23 = vld [vmem:[%s2585_s4] sm:$0xff]  }
 0x243   : > { %1723 = vmatprep.mubr.msk.bf16.mxu0 %vm415_vm1, %v2389_v23 }
 0x244   : > { %1832 = vpow.bf16 %v947_v26 }
 0x245   : > { %1834 = vpow.bf16 %v950_v7 }
 0x246   : > { %v1825_v33 = vpop.eup %1824 }
 0x247   : > { %v1827_v4 = vpop.eup %1826  ;;  %v1006_v39 = vunpack.c.h.bf16 %v1825_v33  ;;  %v1004_v55 = vunpack.c.l.bf16 %v1825_v33 }
 0x248   : > { %1255 = vmatprep.mubr.bf16.mxu1 %v1827_v4  ;;  %v1007_v54 = vunpack.c.h.bf16 %v1827_v4  ;;  %v1005_v18 = vunpack.c.l.bf16 %v1827_v4 }
 0x249   : > { %1256 = vmatmul.mubr.bf16.gmra.mxu1 %v1825_v33 }
 0x24e   : > { %v1829_v59 = vpop.eup %1828 }
 0x24f   : > { %v1831_v11 = vpop.eup %1830  ;;  %v1010_v44 = vunpack.c.h.bf16 %v1829_v59  ;;  %v1008_v48 = vunpack.c.l.bf16 %v1829_v59 }
 0x250   : > { %1263 = vmatprep.mubr.bf16.mxu1 %v1831_v11  ;;  %v1011_v37 = vunpack.c.h.bf16 %v1831_v11  ;;  %v1009_v50 = vunpack.c.l.bf16 %v1831_v11 }
 0x251   : > { %1264 = vmatmul.mubr.bf16.gmra.mxu1 %v1829_v59 }
 0x252   : > { %v1833_v29 = vpop.eup %1832  ;;  %v1103_v2 = vadd.f32 %v1011_v37, %v1010_v44  ;;  %v1100_v3 = vadd.f32 %v1009_v50, %v1008_v48  ;;  %v1366_v37 = vld [vmem:[%s2586_s5 + $0x10] sm:$0xff] }
 0x253   : > { %v1835_v12 = vpop.eup %1834  ;;  %v1014_v36 = vunpack.c.h.bf16 %v1833_v29  ;;  %v1012_v14 = vunpack.c.l.bf16 %v1833_v29 }
 0x254   : > { %1271 = vmatprep.mubr.bf16.mxu1 %v1835_v12  ;;  %v1015_v15 = vunpack.c.h.bf16 %v1835_v12  ;;  %v1013_v49 = vunpack.c.l.bf16 %v1835_v12 }
 0x256   : > { %v1109_v41 = vadd.f32 %v1015_v15, %v1014_v36  ;;  %v1106_v63 = vadd.f32 %v1013_v49, %v1012_v14 }
 0x258   : > { %1110 = vadd.xlane.f32.xlu1 %v1109_v41  ;;  %1107 = vadd.xlane.f32.xlu0 %v1106_v63  ;;  %v1365_v41 = vld [vmem:[%s2586_s5 + $0x8] sm:$0xff]  ;;  %v1364_v63 = vld [vmem:[%s2586_s5] sm:$0xff] }
 0x259   : > { %1272 = vmatmul.mubr.bf16.gmra.mxu1 %v1833_v29 }
 0x25c   : > { %1062 = vadd.xlane.f32.xlu1 %v2293_v5  ;;  %1059 = vadd.xlane.f32.xlu0 %v2295_v43  ;;  %v1097_v5 = vadd.f32 %v1007_v54, %v1006_v39  ;;  %v1094_v43 = vadd.f32 %v1005_v18, %v1004_v55  ;;  %v1367_v39 = vld [vmem:[%s2586_s5 + $0x18] sm:$0xff] }
 0x260   : > { %1056 = vadd.xlane.f32.xlu1 %v2285_v0  ;;  %1053 = vadd.xlane.f32.xlu0 %v2287_v52  ;;  %v1002_v0 = vunpack.c.h.bf16 %v2331_v30  ;;  %v1000_v52 = vunpack.c.l.bf16 %v2331_v30 }
 0x262   : > { %v1091_v21 = vadd.f32 %v1003_v56, %v1002_v0  ;;  %v1088_v1 = vadd.f32 %v1001_v20, %v1000_v52 }
 0x264   : > { %1104 = vadd.xlane.f32.xlu1 %v1103_v2  ;;  %1101 = vadd.xlane.f32.xlu0 %v1100_v3 }
 0x268   : > { %1050 = vadd.xlane.f32.xlu1 %v2277_v60  ;;  %1047 = vadd.xlane.f32.xlu0 %v2279_v61 }
 0x26c   : > { %1098 = vadd.xlane.f32.xlu1 %v1097_v5  ;;  %1095 = vadd.xlane.f32.xlu0 %v1094_v43 }
 0x270   : > { %1044 = vadd.xlane.f32.xlu1 %v2269_v40  ;;  %1041 = vadd.xlane.f32.xlu0 %v2271_v10 }
 0x274   : > { %1092 = vadd.xlane.f32.xlu1 %v1091_v21  ;;  %1089 = vadd.xlane.f32.xlu0 %v1088_v1 }
 0x278   : > { %1038 = vadd.xlane.f32.xlu1 %v2261_v19  ;;  %1035 = vadd.xlane.f32.xlu0 %v2263_v16 }
 0x27c   : > { %1086 = vadd.xlane.f32.xlu1 %v2325_v51  ;;  %1083 = vadd.xlane.f32.xlu0 %v2327_v62 }
 0x280   : > { %1032 = vadd.xlane.f32.xlu1 %v2253_v27  ;;  %1029 = vadd.xlane.f32.xlu0 %v2255_v28 }
 0x284   : > { %1080 = vadd.xlane.f32.xlu1 %v2317_v32  ;;  %1077 = vadd.xlane.f32.xlu0 %v2319_v35 }
 0x288   : > { %1026 = vadd.xlane.f32.xlu1 %v2245_v34  ;;  %1023 = vadd.xlane.f32.xlu0 %v2247_v47 }
 0x28c   : > { %1074 = vadd.xlane.f32.xlu1 %v2309_v38  ;;  %1071 = vadd.xlane.f32.xlu0 %v2311_v17 }
 0x290   : > { %1020 = vadd.xlane.f32.xlu1 %v2237_v24  ;;  %1017 = vadd.xlane.f32.xlu0 %v2239_v25 }
 0x294   : > { %1068 = vadd.xlane.f32.xlu1 %v2301_v22  ;;  %1065 = vadd.xlane.f32.xlu0 %v2303_v13 }
 0x2a1   : > { %v2362_v27 = vpop.f32.mrf.mxu1 }
 0x2a3   : > { %v1155_v28 = vpop.f32.mrf.mxu1 }
 0x2a5   : > { %v2364_v19 = vpop.f32.mrf.mxu1  ;;  %1375 = vperm.xlu1 %1763, %v1365_v41  }
 0x2a7   : > { %v1158_v34 = vpop.f32.mrf.mxu1 }
 0x2a9   : > { %v2366_v16 = vpop.f32.mrf.mxu1  ;;  %1380 = vperm.xlu1 %1763, %v1366_v37  }
 0x2aa   : > { %1370 = vperm.xlu0 %1762, %v1364_v63  }
 0x2ab   : > { %v1163_v47 = vpop.f32.mrf.mxu1 }
 0x2ad   : > { %v2368_v40 = vpop.f32.mrf.mxu1  ;;  %1385 = vperm.xlu1 %1763, %v1367_v39  }
 0x2af   : > { %v1166_v10 = vpop.f32.mrf.mxu1 }
 0x2b1   : > { %v2370_v60 = vpop.f32.mrf.mxu1 }
 0x2b3   : > { %v1171_v24 = vpop.f32.mrf.mxu1 }
 0x2b5   : > { %v2372_v25 = vpop.f32.mrf.mxu1 }
 0x2b7   : > { %v1174_v61 = vpop.f32.mrf.mxu1 }
 0x2b9   : > { %v2374_v22 = vpop.f32.mrf.mxu1 }
 0x2bb   : > { %v1179_v13 = vpop.f32.mrf.mxu1 }
 0x2bd   : > { %v2376_v38 = vpop.f32.mrf.mxu1 }
 0x2bf   : > { %v1182_v17 = vpop.f32.mrf.mxu1 }
 0x2c1   : > { %v2378_v32 = vpop.f32.mrf.mxu1 }
 0x2c3   : > { %v1187_v35 = vpop.f32.mrf.mxu1 }
 0x2c5   : > { %v2380_v51 = vpop.f32.mrf.mxu1 }
 0x2c7   : > { %v1190_v62 = vpop.f32.mrf.mxu1 }
 0x2c9   : > { %v2382_v42 = vpop.f32.mrf.mxu1 }
 0x2cb   : > { %v1195_v53 = vpop.f32.mrf.mxu1 }
 0x2cd   : > { %v2384_v30 = vpop.f32.mrf.mxu1 }
 0x2cf   : > { %v1198_v6 = vpop.f32.mrf.mxu1 }
 0x2d1   : > { %v1201_v57 = vpop.f32.mrf.mxu1 }
 0x2d3   : > { %v1203_v8 = vpop.f32.mrf.mxu1 }
 0x2d5   : > { %v1204_v9 = vpop.f32.mrf.mxu1 }
 0x2d7   : > { %v1206_v31 = vpop.f32.mrf.mxu1 }
 0x2d9   : > { %v1209_v58 = vpop.f32.mrf.mxu1 }
 0x2db   : > { %v1211_v45 = vpop.f32.mrf.mxu1 }
 0x2dd   : > { %v1212_v46 = vpop.f32.mrf.mxu1 }
 0x2df   : > { %v1214_v26 = vpop.f32.mrf.mxu1 }
 0x2e1   : > { %v2393_v7 = vpop.f32.mrf.mxu1  ;;  %v2395_v33 = vpop.xlane.xlu1 %1110 }
 0x2e2   : > { %v2397_v4 = vpop.xlane.xlu0 %1107 }
 0x2e3   : > { %v1219_v59 = vpop.f32.mrf.mxu1 }
 0x2e5   : > { %v2399_v11 = vpop.f32.mrf.mxu1  ;;  %v1063_v29 = vpop.xlane.xlu1 %1062 }
 0x2e6   : > { %1836 = vrcp.f32 %v1063_v29  ;;  %v1060_v12 = vpop.xlane.xlu0 %1059 }
 0x2e7   : > { %1838 = vrcp.f32 %v1060_v12  ;;  %v1222_v36 = vpop.f32.mrf.mxu1 }
 0x2e9   : > { %v2401_v14 = vpop.f32.mrf.mxu1  ;;  %v1057_v15 = vpop.xlane.xlu1 %1056 }
 0x2ea   : > { %1840 = vrcp.f32 %v1057_v15  ;;  %v1054_v49 = vpop.xlane.xlu0 %1053 }
 0x2eb   : > { %1842 = vrcp.f32 %v1054_v49  ;;  %v1227_v44 = vpop.f32.mrf.mxu1 }
 0x2ed   : > { %v2412_v48 = vpop.f32.mrf.mxu1  ;;  %v1105_v50 = vpop.xlane.xlu1 %1104 }
 0x2ee   : > { %v1102_v2 = vpop.xlane.xlu0 %1101 }
 0x2ef   : > { %v1230_v3 = vpop.f32.mrf.mxu1 }
 0x2f1   : > { %v2417_v54 = vpop.f32.mrf.mxu1  ;;  %v1051_v55 = vpop.xlane.xlu1 %1050 }
 0x2f2   : > { %1844 = vrcp.f32 %v1051_v55  ;;  %v1048_v18 = vpop.xlane.xlu0 %1047 }
 0x2f3   : > { %v1837_v5 = vpop.eup %1836  ;;  %1846 = vrcp.f32 %v1048_v18  ;;  %v1235_v43 = vpop.f32.mrf.mxu1 }
 0x2f4   : > { %v1839_v0 = vpop.eup %1838  ;;  %v2419_v56 = vmul.f32 %v1837_v5, %v1212_v46  ;;  %1848 = vrcp.f32 %v2395_v33 }
 0x2f5   : > { %v2421_v52 = vpop.f32.mrf.mxu1  ;;  %v1099_v20 = vpop.xlane.xlu1 %1098  ;;  %v2423_v21 = vmul.f32 %v1839_v0, %v1209_v58  ;;  %1850 = vrcp.f32 %v2397_v4 }
 0x2f6   : > { %v1096_v1 = vpop.xlane.xlu0 %1095 }
 0x2f7   : > { %v1841_v28 = vpop.eup %1840  ;;  %v1238_v34 = vpop.f32.mrf.mxu1  ;;  %v1355_v47 = vpack.c.bf16 %v2419_v56, %v2423_v21 }
 0x2f8   : > { %v1843_v10 = vpop.eup %1842  ;;  %v2427_v24 = vmul.f32 %v1841_v28, %v1204_v9 }
 0x2f9   : > { %v2429_v61 = vpop.f32.mrf.mxu1  ;;  %v2431_v13 = vpop.xlane.xlu1 %1044  ;;  %v2433_v17 = vmul.f32 %v1843_v10, %v1201_v57 }
 0x2fa   : > { %v2435_v35 = vpop.xlane.xlu0 %1041 }
 0x2fb   : > { %v1243_v62 = vpop.f32.mrf.mxu1  ;;  %v1354_v53 = vpack.c.bf16 %v2427_v24, %v2433_v17 }
 0x2fd   : > { %v2439_v6 = vpop.f32.mrf.mxu1  ;;  %v1093_v8 = vpop.xlane.xlu1 %1092 }
 0x2fe   : > { %v1090_v31 = vpop.xlane.xlu0 %1089 }
 0x2ff   : > { %v1845_v58 = vpop.eup %1844  ;;  %v1246_v45 = vpop.f32.mrf.mxu1 }
 0x300   : > { %v1847_v9 = vpop.eup %1846  ;;  %v2442_v46 = vmul.f32 %v1845_v58, %v2384_v30 }
 0x301   : > { %v2444_v26 = vpop.f32.mrf.mxu1  ;;  %v2446_v57 = vpop.xlane.xlu1 %1038  ;;  %v2449_v59 = vmul.f32 %v1847_v9, %v2382_v42 }
 0x302   : > { %v2451_v29 = vpop.xlane.xlu0 %1035  ;;  %v1849_v62 = vpop.eup %1848 }
 0x303   : > { %v1251_v12 = vpop.f32.mrf.mxu1  ;;  %v1353_v36 = vpack.c.bf16 %v2442_v46, %v2449_v59  ;;  %v1851_v45 = vpop.eup %1850 }
 0x305   : > { %v2455_v15 = vpop.f32.mrf.mxu1  ;;  %v1087_v49 = vpop.xlane.xlu1 %1086  ;;  %v1420_v17 = vsel %vm415_vm1, %v1353_v36, 0 }
 0x306   : > { %v1084_v41 = vpop.xlane.xlu0 %1083 }
 0x307   : > { %v1254_v63 = vpop.f32.mrf.mxu1 }
 0x309   : > { %v2457_v30 = vpop.f32.mrf.mxu1  ;;  %v2459_v44 = vpop.xlane.xlu1 %1032 }
 0x30a   : > { %v2461_v37 = vpop.xlane.xlu0 %1029 }
 0x30b   : > { %v1259_v3 = vpop.f32.mrf.mxu1 }
 0x30d   : > { %v1260_v42 = vpop.f32.mrf.mxu1  ;;  %v1081_v39 = vpop.xlane.xlu1 %1080 }
 0x30e   : > { %1852 = vrcp.f32 %v1081_v39  ;;  %v1078_v55 = vpop.xlane.xlu0 %1077 }
 0x30f   : > { %1854 = vrcp.f32 %v1078_v55  ;;  %v1262_v18 = vpop.f32.mrf.mxu1 }
 0x310   : > { %1856 = vrcp.f32 %v1105_v50 }
 0x311   : > { %v1265_v5 = vpop.f32.mrf.mxu1  ;;  %v2465_v43 = vpop.xlane.xlu1 %1026  ;;  %1858 = vrcp.f32 %v1102_v2 }
 0x312   : > { %v2467_v0 = vpop.xlane.xlu0 %1023 }
 0x313   : > { %v1267_v28 = vpop.f32.mrf.mxu1 }
 0x315   : > { %v1268_v34 = vpop.f32.mrf.mxu1  ;;  %v1075_v10 = vpop.xlane.xlu1 %1074 }
 0x316   : > { %1860 = vrcp.f32 %v1075_v10  ;;  %v1072_v33 = vpop.xlane.xlu0 %1071 }
 0x317   : > { %1862 = vrcp.f32 %v1072_v33  ;;  %v1270_v4 = vpop.f32.mrf.mxu1 }
 0x318   : > { %1864 = vrcp.f32 %v1099_v20 }
 0x319   : > { %v1273_v58 = vpop.f32.mrf.mxu1  ;;  %1866 = vrcp.f32 %v1096_v1 }
 0x31a   : > { %1868 = vrcp.f32 %v1093_v8  ;;  %v1342_v18 = vmul.f32 %v1851_v45, %v1273_v58 }
 0x31b   : > { %v1853_v9 = vpop.eup %1852  ;;  %v1275_v50 = vpop.f32.mrf.mxu1  ;;  %1870 = vrcp.f32 %v1090_v31 }
 0x31c   : > { %v1855_v12 = vpop.eup %1854  ;;  %v2470_v63 = vmul.f32 %v1853_v9, %v2421_v52  ;;  %1872 = vrcp.f32 %v2431_v13 }
 0x31d   : > { %v1857_v2 = vpop.eup %1856  ;;  %v1276_v3 = vpop.f32.mrf.mxu1  ;;  %v2473_v39 = vmul.f32 %v1855_v12, %v2417_v54  ;;  %1874 = vrcp.f32 %v2435_v35  ;;  %v1426_v54 = vsel %vm415_vm1, %v1355_v47, 0 }
 0x31e   : > { %v1341_v55 = vmul.f32 %v1857_v2, %v1268_v34  ;;  %v1343_v20 = vmul.f32 %v1849_v62, %v1276_v3  ;;  %v1859_v28 = vpop.eup %1858  ;;  %1876 = vrcp.f32 %v1087_v49 }
 0x31f   : > { %v1278_v10 = vpop.f32.mrf.mxu1  ;;  %v1358_v1 = vpack.c.bf16 %v2470_v63, %v2473_v39  ;;  %v1340_v33 = vmul.f32 %v1859_v28, %v1265_v5  ;;  %1878 = vrcp.f32 %v1084_v41 }
 0x320   : > { %v1363_v52 = vpack.c.bf16 %v1343_v20, %v1342_v18  ;;  %1880 = vrcp.f32 %v2446_v57 }
 0x321   : > { %v1362_v8 = vpack.c.bf16 %v1341_v55, %v1340_v33  ;;  %1882 = vrcp.f32 %v2451_v29 }
 0x322   : > { %1729 = vmatprep.subr.msk.bf16.mxu0 %vm415_vm1, %v1363_v52  ;;  %1884 = vrcp.f32 %v2459_v44 }
 0x323   : > { %v1861_v31 = vpop.eup %1860  ;;  %1708 = vmatpush3.bf16.xpose.msra.mxu0 %v1426_v54  ;;  %1886 = vrcp.f32 %v2461_v37 }
 0x324   : > { %v1863_v34 = vpop.eup %1862  ;;  %1730 = vmatprep.subr.msk.bf16.mxu0 %vm415_vm1, %v1362_v8  ;;  %v2486_v4 = vmul.f32 %v1861_v31, %v2412_v48  ;;  %1888 = vrcp.f32 %v2465_v43 }
 0x325   : > { %v1865_v13 = vpop.eup %1864  ;;  %v2489_v35 = vmul.f32 %v1863_v34, %v2401_v14  ;;  %v1423_v14 = vsel %vm415_vm1, %v1354_v53, 0  ;;  %1890 = vrcp.f32 %v2467_v0 }
 0x326   : > { %v1339_v5 = vmul.f32 %v1865_v13, %v1260_v42  ;;  %v1867_v62 = vpop.eup %1866 }
 0x327   : > { %v1357_v56 = vpack.c.bf16 %v2486_v4, %v2489_v35  ;;  %v1338_v21 = vmul.f32 %v1867_v62, %v2457_v30  ;;  %v1869_v47 = vpop.eup %1868  ;;  %v1505_v4 = vld [vmem:[%s2549_s30] sm:$0xff]  ;;  %v1506_v35 = vld [vmem:[%s2549_s30 + $0x8] sm:$0xff] }
 0x328   : > { %v1871_v49 = vpop.eup %1870  ;;  %v1337_v30 = vmul.f32 %v1869_v47, %v2455_v15  ;;  %v1018_v15 = vpop.xlane.xlu0 %1017 }
 0x329   : > { %v1361_v48 = vpack.c.bf16 %v1339_v5, %v1338_v21  ;;  %v1873_v41 = vpop.eup %1872  ;;  %v1336_v58 = vmul.f32 %v1871_v49, %v2444_v26  ;;  %v1021_v26 = vpop.xlane.xlu1 %1020  ;;  %v1507_v21 = vld [vmem:[%s2549_s30 + $0x10] sm:$0xff]  ;;  %v1508_v49 = vld [vmem:[%s2549_s30 + $0x18] sm:$0xff] }
 0x32a   : > { %v1875_v42 = vpop.eup %1874  ;;  %v1321_v29 = vmul.f32 %v1873_v41, %v2380_v51 }
 0x32b   : > { %1710 = vmatpush3.bf16.xpose.msra.mxu0 %v1423_v14  ;;  %v1320_v57 = vmul.f32 %v1875_v42, %v2378_v32  ;;  %v1877_v45 = vpop.eup %1876  ;;  %v1360_v24 = vpack.c.bf16 %v1337_v30, %v1336_v58 }
 0x32c   : > { %1731 = vmatprep.subr.msk.bf16.mxu0 %vm415_vm1, %v1361_v48  ;;  %v1879_v53 = vpop.eup %1878  ;;  %v1335_v51 = vmul.f32 %v1877_v45, %v2439_v6  ;;  %v1066_v2 = vpop.xlane.xlu0 %1065 }
 0x32d   : > { %v1352_v44 = vpack.c.bf16 %v1321_v29, %v1320_v57  ;;  %v1881_v9 = vpop.eup %1880  ;;  %v1334_v32 = vmul.f32 %v1879_v53, %v2429_v61  ;;  %v1069_v46 = vpop.xlane.xlu1 %1068  ;;  %v1509_v57 = vld [vmem:[%s2549_s30 + $0x20] sm:$0xff] }
 0x32e   : > { %v1883_v50 = vpop.eup %1882  ;;  %v1319_v12 = vmul.f32 %v1881_v9, %v2376_v38  ;;  %1892 = vrcp.f32 %v1069_v46  ;;  %v1511_v9 = vld [vmem:[%s2549_s30 + $0x30] sm:$0xff] }
 0x32f   : > { %v1417_v37 = vsel %vm415_vm1, %v1352_v44, 0  ;;  %v1359_v59 = vpack.c.bf16 %v1335_v51, %v1334_v32  ;;  %v1318_v36 = vmul.f32 %v1883_v50, %v2374_v22  ;;  %v1885_v61 = vpop.eup %1884  ;;  %1894 = vrcp.f32 %v1066_v2 }
 0x330   : > { %v1887_v3 = vpop.eup %1886  ;;  %1896 = vrcp.f32 %v1021_v26  ;;  %v1317_v55 = vmul.f32 %v1885_v61, %v2372_v25 }
 0x331   : > { %v1351_v6 = vpack.c.bf16 %v1319_v12, %v1318_v36  ;;  %1898 = vrcp.f32 %v1018_v15  ;;  %v1316_v0 = vmul.f32 %v1887_v3, %v2370_v60  ;;  %v1889_v22 = vpop.eup %1888 }
 0x332   : > { %v1891_v18 = vpop.eup %1890  ;;  %v1315_v33 = vmul.f32 %v1889_v22, %v2368_v40 }
 0x333   : > { %1712 = vmatpush3.bf16.xpose.msra.mxu0 %v1420_v17  ;;  %v1414_v43 = vsel %vm415_vm1, %v1351_v6, 0  ;;  %v1350_v38 = vpack.c.bf16 %v1317_v55, %v1316_v0  ;;  %v1314_v10 = vmul.f32 %v1891_v18, %v2366_v16  ;;  %v1510_v17 = vld [vmem:[%s2549_s30 + $0x28] sm:$0xff] }
 0x334   : > { %1732 = vmatprep.subr.msk.bf16.mxu0 %vm415_vm1, %v1360_v24 }
 0x335   : > { %v1411_v28 = vsel %vm415_vm1, %v1350_v38, 0  ;;  %v1349_v25 = vpack.c.bf16 %v1315_v33, %v1314_v10 }
 0x337   : > { %v1408_v8 = vsel %vm415_vm1, %v1349_v25, 0 }
 0x33b   : > { %1714 = vmatpush3.bf16.xpose.msra.mxu0 %v1417_v37  ;;  %v1893_v20 = vpop.eup %1892  ;;  %v1512_v37 = vld [vmem:[%s2549_s30 + $0x38] sm:$0xff] }
 0x33c   : > { %1733 = vmatprep.subr.msk.bf16.mxu0 %vm415_vm1, %v1359_v59  ;;  %v1895_v52 = vpop.eup %1894  ;;  %v1329_v39 = vmul.f32 %v1893_v20, %v2399_v11  ;;  %v1376_v11 = vpop.permute.xlu1 %1375 }
 0x33d   : > { %v1897_v60 = vpop.eup %1896  ;;  %v1328_v63 = vmul.f32 %v1895_v52, %v2393_v7  ;;  %v1771_v7 = vld [vmem:[%s2585_s4 + $0x8] sm:$0xff]  }
 0x33e   : > { %v1313_v16 = vmul.f32 %v1897_v60, %v2364_v19 }
 0x33f   : > { %v1356_v54 = vpack.c.bf16 %v1329_v39, %v1328_v63 }
 0x340   : > { %v1381_v41 = vpop.permute.xlu1 %1380 }
 0x343   : > { %1716 = vmatpush3.bf16.xpose.msra.mxu0 %v1414_v43 }
 0x344   : > { %1734 = vmatprep.subr.msk.bf16.mxu0 %vm415_vm1, %v1358_v1  ;;  %v1899_v1 = vpop.eup %1898  ;;  %v1386_v44 = vpop.permute.xlu1 %1385 }
 0x345   : > { %v1312_v31 = vmul.f32 %v1899_v1, %v2362_v27  ;;  %v1371_v27 = vpop.permute.xlu0 %1370 }
 0x347   : > { %v1348_v40 = vpack.c.bf16 %v1313_v16, %v1312_v31 }
 0x349   : > { %v1405_v34 = vsel %vm415_vm1, %v1348_v40, 0 }
 0x34b   : > { %1718 = vmatpush3.bf16.xpose.msra.mxu0 %v1411_v28 }
 0x34c   : > { %1735 = vmatprep.subr.msk.bf16.mxu0 %vm415_vm1, %v1357_v56 }
 0x353   : > { %1720 = vmatpush3.bf16.xpose.msra.mxu0 %v1408_v8 }
 0x354   : > { %1736 = vmatprep.subr.msk.bf16.mxu0 %vm415_vm1, %v1356_v54 }
 0x35b   : > { %1722 = vmatpush3.bf16.xpose.msra.mxu0 %v1405_v34 }
 0x362   : > { %1724 = vmatmul.mubr.msk.bf16.vlgmr.msra.gmra.mxu0 %vm415_vm1, %v2389_v23 }
 0x363   : > { %1725 = vmatprep.mubr.msk.bf16.mxu0 %vm415_vm1, %v1771_v7 }
 0x36a   : > { %1726 = vmatmul.mubr.msk.bf16.gmra.mxu0 %vm415_vm1, %v1771_v7 }
 0x422   : > { %v1486_v19 = vpop.f32.mrf.mxu0 }
 0x423   : > { %v1487_v13 = vadd.f32 %v1486_v19, %v1371_v27 }
 0x424   : > { %v1488_v23 = vpop.f32.mrf.mxu0 }
 0x425   : > { %v1489_v5 = vadd.f32 %v1488_v23, %v1371_v27  ;;  %v1513_v62 = vadd.f32 %v1505_v4, %v1487_v13 }
 0x426   : > { %v1490_v56 = vpop.f32.mrf.mxu0 }
 0x427   : > { %v1491_v47 = vadd.f32 %v1490_v56, %v1376_v11  ;;  %v1514_v48 = vadd.f32 %v1506_v35, %v1489_v5  ;;  %1521 = vst [vmem:[%s2555_s9] sm:$0xff] %v1513_v62 }
 0x428   : > { %v1492_v14 = vpop.f32.mrf.mxu0 }
 0x429   : > { %v1515_v42 = vadd.f32 %v1507_v21, %v1491_v47  ;;  %v1493_v58 = vadd.f32 %v1492_v14, %v1376_v11  ;;  %1522 = vst [vmem:[%s2555_s9 + $0x8] sm:$0xff] %v1514_v48 }
 0x42a   : > { %v1496_v30 = vpop.f32.mrf.mxu0 }
 0x42b   : > { %1523 = vst [vmem:[%s2555_s9 + $0x10] sm:$0xff] %v1515_v42  ;;  %v1516_v29 = vadd.f32 %v1508_v49, %v1493_v58  ;;  %v1497_v45 = vadd.f32 %v1496_v30, %v1381_v41 }
 0x42c   : > { %v1498_v24 = vpop.f32.mrf.mxu0 }
 0x42d   : > { %1524 = vst [vmem:[%s2555_s9 + $0x18] sm:$0xff] %v1516_v29  ;;  %v1517_v53 = vadd.f32 %v1509_v57, %v1497_v45  ;;  %v1499_v26 = vadd.f32 %v1498_v24, %v1381_v41 }
 0x42e   : > { %v1500_v15 = vpop.f32.mrf.mxu0 }
 0x42f   : > { %1525 = vst [vmem:[%s2555_s9 + $0x20] sm:$0xff] %v1517_v53  ;;  %v1518_v32 = vadd.f32 %v1510_v17, %v1499_v26  ;;  %v1501_v51 = vadd.f32 %v1500_v15, %v1386_v44 }
 0x430   : > { %v1502_v50 = vpop.f32.mrf.mxu0 }
 0x431   : > { %1526 = vst [vmem:[%s2555_s9 + $0x28] sm:$0xff] %v1518_v32  ;;  %v1519_v46 = vadd.f32 %v1511_v9, %v1501_v51  ;;  %v1503_v59 = vadd.f32 %v1502_v50, %v1386_v44 }
 0x433   : > { %1527 = vst [vmem:[%s2555_s9 + $0x30] sm:$0xff] %v1519_v46  ;;  %v1520_v36 = vadd.f32 %v1512_v37, %v1503_v59 }
 0x435   : > { %1528 = vst [vmem:[%s2555_s9 + $0x38] sm:$0xff] %v1520_v36 }
 0x436 PF: > { %s16_s23 = sadd.s32 1, %s1922_s23   ;;  %s2633_s21 = smov %s1918_s22 }
 0x437   : > { %p13_p5 = scmp.ge.s32.totalorder %s16_s23, 4   ;;  %s2634_s22 = smov %s2636_s24 }
 0x439   :  { %15 = sbr.rel (!%p13_p5) target bundleno = 2 (0x2), region = 83 }

</bundles_post_ra>
